<compile_context>
chip_gen: v7x
topology: tpu7x:2x2x1
jax: 0.10.0
libtpu: 0.0.40
codegen_flags: <defaults>
</compile_context>

<pallas_src>
import math
from functools import partial

import jax
import jax.numpy as jnp
import numpy as np
from jax import lax
from jax.experimental import pallas as pl
from jax.experimental.pallas import tpu as pltpu

VMEM_LIMIT_BYTES = 32 * 1024 * 1024


# ----------------------------- shared math helpers -----------------------------

def _l2normalize(x, eps=1e-12):
    """matches torch.nn.functional.normalize(p=2, dim=-1); rsqrt -> EUP slot."""
    ss = jnp.sum(x * x, axis=-1, keepdims=True)
    return x * lax.rsqrt(jnp.maximum(ss, eps * eps))


def rotary_tables(head_dim, seq_len):
    """cos/sin tables matching the PyTorch Rotary module, pre-expanded so RoPE is
    out = x*cos_full + roll(x, Dh//2)*sin_signed."""
    dim_quarter = max(1, head_dim // 4)
    dim_half = head_dim // 2
    angular_freq = (1.0 / 1024.0) ** jnp.linspace(0.0, 1.0, dim_quarter, dtype=jnp.float32)
    angular_freq = jnp.concatenate(
        [angular_freq, jnp.zeros((dim_half - dim_quarter,), jnp.float32)])
    t = jnp.arange(seq_len, dtype=jnp.float32)
    theta = t[:, None] * angular_freq[None, :]          # (T, Dh/2)
    cos_h, sin_h = jnp.cos(theta), jnp.sin(theta)
    cos_full = jnp.concatenate([cos_h, cos_h], axis=-1)       # (T, Dh)
    sin_signed = jnp.concatenate([sin_h, -sin_h], axis=-1)    # (T, Dh)
    return cos_full, sin_signed


# ------------------------ kernel A: fused QKV + qk-norm + RoPE -------------------

def _qkv_rope_kernel(num_heads, head_dim,
                     x_ref, wqkv_ref, sq_ref, sk_ref, cos_ref, sin_ref,
                     q_ref, k_ref, v_ref):
    xb = x_ref[...]                                                        # (TQ, D) bf16
    qkv = jnp.dot(xb, wqkv_ref[...], preferred_element_type=jnp.float32)   # (TQ, 3*H*Dh)
    cosf = cos_ref[...]                  # (TQ, Dh)   [cos, cos]
    sinf = sin_ref[...]                  # (TQ, Dh)   [sin, -sin]
    hd = num_heads * head_dim
    half = head_dim // 2
    for h in range(num_heads):
        lo = h * head_dim
        # sq already carries the 0.12 attention scale (folded in the wrapper).
        q_h = _l2normalize(qkv[:, lo:lo + head_dim]) * sq_ref[h]
        k_h = _l2normalize(qkv[:, hd + lo:hd + lo + head_dim]) * sk_ref[h]
        v_h = qkv[:, 2 * hd + lo:2 * hd + lo + head_dim]
        # rotate-half RoPE via lane rotation (XLU), no permutation matmul
        q_h = q_h * cosf + pltpu.roll(q_h, half, 1) * sinf
        k_h = k_h * cosf + pltpu.roll(k_h, half, 1) * sinf
        q_ref[h] = q_h.astype(jnp.bfloat16)
        k_ref[h] = k_h.astype(jnp.bfloat16)
        v_ref[h] = v_h.astype(jnp.bfloat16)


# ----------- kernel B: flash attention + fused Block epilogue (per q tile) -------

def _flash_block_kernel(num_heads, mlp_scale,
                        q_ref, k_ref, v_ref, x_ref, wo_ref,
                        wa_ref, waT_ref, wm_ref, wmT_ref, msk_ref,
                        wup_ref, wgate_ref, wdown_ref, su_ref, sv_ref,
                        o_ref, m_sc, l_sc, acc_sc):
    qi = pl.program_id(0)
    ki = pl.program_id(1)
    tq = q_ref.shape[1]
    tk = k_ref.shape[1]
    bf = jnp.bfloat16

    @pl.when(ki == 0)
    def _init():
        m_sc[...] = jnp.full(m_sc.shape, -jnp.inf, jnp.float32)
        l_sc[...] = jnp.zeros(l_sc.shape, jnp.float32)
        acc_sc[...] = jnp.zeros(acc_sc.shape, jnp.float32)

    def online_update(masked):
        # attn scale already folded into q (kernel A), no per-step score scale.
        s = jnp.einsum("hqd,hkd->hqk", q_ref[...], k_ref[...],
                       preferred_element_type=jnp.float32)
        if masked:
            # diagonal tile (qi == ki, tq == tk): local row/col indices suffice.
            row = lax.broadcasted_iota(jnp.int32, (tq, tk), 0)
            col = lax.broadcasted_iota(jnp.int32, (tq, tk), 1)
            s = jnp.where((col <= row)[None, :, :], s, -1e30)
        m_prev = m_sc[...]
        m_new = jnp.maximum(m_prev, jnp.max(s, axis=-1, keepdims=True))
        alpha = jnp.exp(m_prev - m_new)
        p = jnp.exp(s - m_new)                           # (H, TQ, TK)
        l_sc[...] = alpha * l_sc[...] + jnp.sum(p, axis=-1, keepdims=True)
        acc_sc[...] = alpha * acc_sc[...] + jnp.einsum(
            "hqk,hkd->hqd", p.astype(bf), v_ref[...],
            preferred_element_type=jnp.float32)
        m_sc[...] = m_new

    # Off-diagonal contributing tiles: no mask / iota / select work at all.
    @pl.when(ki < qi)
    def _off_diagonal():
        online_update(masked=False)

    # Diagonal tile is the last contributor for this query tile -> masked update
    # plus the fused row-wise epilogue (Wo, MoScale_A, MLP, MoScale_M).
    @pl.when(ki == qi)
    def _diagonal():
        online_update(masked=True)

        x = x_ref[...]                                   # (TQ, D) f32

        # Attention output: normalize per head, concat lanes, one K=H*Dh matmul.
        o_heads = []
        for h in range(num_heads):
            inv_l = pl.reciprocal(l_sc[h], approx=True)            # (TQ, 1)
            o_heads.append((acc_sc[h] * inv_l).astype(bf))          # (TQ, Dh)
        o_cat = jnp.concatenate(o_heads, axis=-1)                   # (TQ, H*Dh)
        y = jnp.dot(o_cat, wo_ref[...], preferred_element_type=jnp.float32)
        x_a = _l2normalize(y)

        def moscale(xin, w_ref_, wT_ref_):
            # Lane-padded rank (128 wide); msk adds -1e30 to the padded columns
            # so their probability underflows to exactly 0. Exact reciprocal.
            logits = jnp.dot(xin.astype(bf), w_ref_[...],
                             preferred_element_type=jnp.float32) + msk_ref[...]
            m = jnp.max(logits, axis=-1, keepdims=True)
            e = jnp.exp(logits - m)
            probs = e / jnp.sum(e, axis=-1, keepdims=True)
            return jnp.dot(probs.astype(bf), wT_ref_[...],
                           preferred_element_type=jnp.float32)      # (TQ, D)

        x1 = _l2normalize(x + moscale(x, wa_ref, waT_ref) * (x_a - x))

        x1b = x1.astype(bf)
        u = jnp.dot(x1b, wup_ref[...], preferred_element_type=jnp.float32) * su_ref[...]
        v = (jnp.dot(x1b, wgate_ref[...], preferred_element_type=jnp.float32)
             * sv_ref[...] * mlp_scale)
        hidden = (u * (v * (1.0 / (1.0 + jnp.exp(-v))))).astype(bf)
        x_m = _l2normalize(jnp.dot(hidden, wdown_ref[...],
                                   preferred_element_type=jnp.float32))

        o_ref[...] = _l2normalize(x1 + moscale(x1, wm_ref, wmT_ref) * (x_m - x1))


# --------------------------------- wrapper --------------------------------------

def block_forward(x_BTD, params, num_heads, head_dim):
    B, T, D = x_BTD.shape
    assert B == 1, "Must use batch size = 1 (mirrors FlexAttention constraint)"
    hd = num_heads * head_dim
    hdim = params["Wup"].shape[1]
    rank = params["wA"].shape[1]
    rpad = ((rank + 127) // 128) * 128          # lane-pad MoScale rank

    # Row tile: 256 fills the 256-deep MXU rows on v6e/v7x when there are >=2
    # q tiles (keeps megacore busy); 128 otherwise (and preferred on v5e).
    if T % 256 == 0 and T >= 512:
        tq = 256
    elif T % 128 == 0:
        tq = 128
    else:
        tq = T
    n_tiles = T // tq

    bf = jnp.bfloat16
    x2d = x_BTD[0].astype(jnp.float32)          # f32 residual copy for kernel B
    x_bf = x2d.astype(bf)                       # bf16 feed for kernel A
    wqkv = jnp.concatenate([params["Wq"], params["Wk"], params["Wv"]], axis=1).astype(bf)
    sqk = params["s_qk_eff"].reshape(num_heads, 1, head_dim).astype(jnp.float32)
    sqk_q = sqk * 0.12                          # attn scale folded into q once
    cos_full, sin_signed = rotary_tables(head_dim, T)

    # ---- kernel A: fused QKV projection + qk-norm + rotary, tiled over rows ----
    q, k, v = pl.pallas_call(
        partial(_qkv_rope_kernel, num_heads, head_dim),
        grid=(n_tiles,),
        out_shape=tuple(jax.ShapeDtypeStruct((num_heads, T, head_dim), bf)
                        for _ in range(3)),
        in_specs=[
            pl.BlockSpec((tq, D), lambda i: (i, 0)),
            pl.BlockSpec((D, 3 * hd), lambda i: (0, 0),
                         pipeline_mode=pl.Buffered(1)),                       # resident
            pl.BlockSpec((num_heads, 1, head_dim), lambda i: (0, 0, 0),
                         pipeline_mode=pl.Buffered(1)),                       # resident
            pl.BlockSpec((num_heads, 1, head_dim), lambda i: (0, 0, 0),
                         pipeline_mode=pl.Buffered(1)),                       # resident
            pl.BlockSpec((tq, head_dim), lambda i: (i, 0)),
            pl.BlockSpec((tq, head_dim), lambda i: (i, 0)),
        ],
        out_specs=tuple(pl.BlockSpec((num_heads, tq, head_dim), lambda i: (0, i, 0))
                        for _ in range(3)),
        compiler_params=pltpu.CompilerParams(
            dimension_semantics=("parallel",),
            vmem_limit_bytes=VMEM_LIMIT_BYTES),
    )(x_bf, wqkv, sqk_q, sqk, cos_full, sin_signed)

    # MoScale weights: zero-pad rank to a full lane width; pass both orientations
    # so both MoScale matmuls are plain NN matmuls with lane-dense outputs.
    def pad_rank(w):
        return jnp.pad(w, ((0, 0), (0, rpad - rank))).astype(bf)

    wa_pad = pad_rank(params["wA"])
    wm_pad = pad_rank(params["wM"])
    wa_padT = wa_pad.T
    wm_padT = wm_pad.T
    ms_bias = jnp.where(jnp.arange(rpad) < rank, 0.0, -1e30).astype(jnp.float32)
    ms_bias = ms_bias.reshape(1, rpad)

    # ---- kernel B: flash attention over (q_tile, kv_tile) + fused Block epilogue ----
    out = pl.pallas_call(
        partial(_flash_block_kernel, num_heads, math.sqrt(D)),
        grid=(n_tiles, n_tiles),
        out_shape=jax.ShapeDtypeStruct((T, D), jnp.float32),
        in_specs=[
            pl.BlockSpec((num_heads, tq, head_dim), lambda i, j: (0, i, 0)),   # q
            # clamp above-diagonal KV block indices -> no DMA for skipped steps
            pl.BlockSpec((num_heads, tq, head_dim),
                         lambda i, j: (0, jnp.minimum(i, j), 0)),              # k
            pl.BlockSpec((num_heads, tq, head_dim),
                         lambda i, j: (0, jnp.minimum(i, j), 0)),              # v
            pl.BlockSpec((tq, D), lambda i, j: (i, 0)),                        # x
            pl.BlockSpec((hd, D), lambda i, j: (0, 0),
                         pipeline_mode=pl.Buffered(1)),                        # Wo
            pl.BlockSpec((D, rpad), lambda i, j: (0, 0),
                         pipeline_mode=pl.Buffered(1)),                        # wA
            pl.BlockSpec((rpad, D), lambda i, j: (0, 0),
                         pipeline_mode=pl.Buffered(1)),                        # wA^T
            pl.BlockSpec((D, rpad), lambda i, j: (0, 0),
                         pipeline_mode=pl.Buffered(1)),                        # wM
            pl.BlockSpec((rpad, D), lambda i, j: (0, 0),
                         pipeline_mode=pl.Buffered(1)),                        # wM^T
            pl.BlockSpec((1, rpad), lambda i, j: (0, 0),
                         pipeline_mode=pl.Buffered(1)),                        # pad bias
            pl.BlockSpec((D, hdim), lambda i, j: (0, 0),
                         pipeline_mode=pl.Buffered(1)),                        # Wup
            pl.BlockSpec((D, hdim), lambda i, j: (0, 0),
                         pipeline_mode=pl.Buffered(1)),                        # Wgate
            pl.BlockSpec((hdim, D), lambda i, j: (0, 0),
                         pipeline_mode=pl.Buffered(1)),                        # Wdown
            pl.BlockSpec((1, hdim), lambda i, j: (0, 0),
                         pipeline_mode=pl.Buffered(1)),                        # s_u
            pl.BlockSpec((1, hdim), lambda i, j: (0, 0),
                         pipeline_mode=pl.Buffered(1)),                        # s_v
        ],
        out_specs=pl.BlockSpec((tq, D), lambda i, j: (i, 0)),
        scratch_shapes=[
            pltpu.VMEM((num_heads, tq, 1), jnp.float32),          # running max
            pltpu.VMEM((num_heads, tq, 1), jnp.float32),          # running sum
            pltpu.VMEM((num_heads, tq, head_dim), jnp.float32),   # running acc
        ],
        compiler_params=pltpu.CompilerParams(
            dimension_semantics=("parallel", "arbitrary"),
            vmem_limit_bytes=VMEM_LIMIT_BYTES),
    )(q, k, v, x2d, params["Wo"].astype(bf),
      wa_pad, wa_padT, wm_pad, wm_padT, ms_bias,
      params["Wup"].astype(bf), params["Wgate"].astype(bf), params["Wdown"].astype(bf),
      params["s_u_eff"].astype(jnp.float32), params["s_v_eff"].astype(jnp.float32))
    return out[None]


# --------------------------- pure-JAX reference ----------------------------------
# mirrors the kernel's bf16 cast points so the comparison tolerance can stay tight

def block_reference(x_BTD, params, num_heads, head_dim):
    x = x_BTD[0].astype(jnp.float32)
    T, D = x.shape
    hd = num_heads * head_dim
    bf = jnp.bfloat16
    cos_full, sin_signed = rotary_tables(head_dim, T)

    def l2n(a):
        n = jnp.sqrt(jnp.sum(a * a, axis=-1, keepdims=True))
        return a / jnp.maximum(n, 1e-12)

    wqkv = jnp.concatenate([params["Wq"], params["Wk"], params["Wv"]], axis=1).astype(bf)
    qkv = jnp.dot(x.astype(bf), wqkv, preferred_element_type=jnp.float32)
    sqk = params["s_qk_eff"].reshape(num_heads, 1, head_dim)
    wo_heads = params["Wo"].reshape(num_heads, head_dim, D).astype(bf)
    causal = jnp.arange(T)[None, :] <= jnp.arange(T)[:, None]

    y = jnp.zeros((T, D), jnp.float32)
    for h in range(num_heads):
        lo = h * head_dim
        qh = l2n(qkv[:, lo:lo + head_dim]) * sqk[h]
        kh = l2n(qkv[:, hd + lo:hd + lo + head_dim]) * sqk[h]
        vh = qkv[:, 2 * hd + lo:2 * hd + lo + head_dim].astype(bf)
        qh = (qh * cos_full + jnp.roll(qh, head_dim // 2, axis=-1) * sin_signed).astype(bf)
        kh = (kh * cos_full + jnp.roll(kh, head_dim // 2, axis=-1) * sin_signed).astype(bf)
        s = jnp.dot(qh, kh.T, preferred_element_type=jnp.float32) * 0.12
        s = jnp.where(causal, s, -1e30)
        p = jax.nn.softmax(s, axis=-1)
        oh = jnp.dot(p.astype(bf), vh, preferred_element_type=jnp.float32).astype(bf)
        y = y + jnp.dot(oh, wo_heads[h], preferred_element_type=jnp.float32)
    x_a = l2n(y)

    def moscale(xin, w):
        wb = w.astype(bf)
        logits = jnp.dot(xin.astype(bf), wb, preferred_element_type=jnp.float32)
        probs = jax.nn.softmax(logits, axis=-1)
        return jnp.dot(probs.astype(bf), wb.T, preferred_element_type=jnp.float32)

    x1 = l2n(x + moscale(x, params["wA"]) * (x_a - x))
    u = jnp.dot(x1.astype(bf), params["Wup"].astype(bf),
                preferred_element_type=jnp.float32) * params["s_u_eff"]
    v = (jnp.dot(x1.astype(bf), params["Wgate"].astype(bf),
                 preferred_element_type=jnp.float32)
         * params["s_v_eff"] * math.sqrt(D))
    hidden = (u * (v * (1.0 / (1.0 + jnp.exp(-v))))).astype(bf)
    x_m = l2n(jnp.dot(hidden, params["Wdown"].astype(bf),
                      preferred_element_type=jnp.float32))
    x2 = l2n(x1 + moscale(x1, params["wM"]) * (x_m - x1))
    return x2[None]


# ------------------------------ parameter init -----------------------------------

def init_params(key, dim, num_heads, head_dim, mlp_ratio, moe_rank):
    hdim = int(mlp_ratio * dim)
    hd = num_heads * head_dim
    ks = jax.random.split(key, 12)

    def lin(k, fan_in, shape):
        return jax.random.uniform(k, shape, jnp.float32, -1.0, 1.0) / math.sqrt(fan_in)

    p = {}
    p["Wq"] = lin(ks[0], dim, (dim, hd))
    p["Wk"] = lin(ks[1], dim, (dim, hd))
    p["Wv"] = lin(ks[2], dim, (dim, hd))
    p["Wo"] = lin(ks[3], hd, (hd, dim))
    # Scale(head_dim, heads=H, scale=1/sqrt(dim)): effective = s * sqrt(dim)
    s_qk = (1.0 + 0.05 * jax.random.normal(ks[4], (num_heads, head_dim), jnp.float32)) \
        / math.sqrt(dim)
    p["s_qk_eff"] = s_qk * math.sqrt(dim)
    p["Wup"] = lin(ks[5], dim, (dim, hdim))
    p["Wgate"] = lin(ks[6], dim, (dim, hdim))
    p["Wdown"] = lin(ks[7], hdim, (hdim, dim))
    p["s_u_eff"] = 1.0 + 0.05 * jax.random.normal(ks[8], (1, hdim), jnp.float32)
    p["s_v_eff"] = 1.0 + 0.05 * jax.random.normal(ks[9], (1, hdim), jnp.float32)

    # MoScale(dim, rank): s init ~ ones*scale/rank (scale=1/sqrt(dim)); w = s*(0.05/scale)
    def moscale_w(k):
        s = (1.0 + 0.05 * jax.random.normal(k, (dim, moe_rank), jnp.float32)) \
            * (1.0 / math.sqrt(dim)) / moe_rank
        return s * (0.05 * math.sqrt(dim))

    p["wA"] = moscale_w(ks[10])
    p["wM"] = moscale_w(ks[11])
    return p


# ------------------------------------ main ----------------------------------------

if __name__ == "__main__":
    # lane-dense demo config: D, head_dim, hdim multiples of 128; two row tiles.
    dim, num_heads, mlp_ratio = 256, 2, 4
    head_dim = dim // num_heads        # 128
    T = 256
    moe_rank = 4                       # MoScale rank (< dim)

    root = jax.random.PRNGKey(0)
    k_param, k_x = jax.random.split(root)
    params = init_params(k_param, dim, num_heads, head_dim, mlp_ratio, moe_rank)
    x = jax.random.normal(k_x, (1, T, dim), jnp.float32)

    out = block_forward(x, params, num_heads, head_dim)
    out = jax.block_until_ready(out)

    assert out.shape == (1, T, dim)
    assert bool(jnp.all(jnp.isfinite(out)))
    # final op is an L2 normalize, so every row must be unit norm
    norms = np.asarray(jnp.linalg.norm(out[0], axis=-1))
    assert np.allclose(norms, 1.0, atol=1e-4), norms

    ref = np.asarray(block_reference(x, params, num_heads, head_dim))
    err = float(np.max(np.abs(np.asarray(out) - ref)))
    assert np.allclose(np.asarray(out), ref, atol=5e-3, rtol=5e-3), err

    print("KERNEL_OK")
</pallas_src>

<mosaic_0001>
module attributes {stable_mosaic.version = 11 : i64} {
  func.func @_qkv_rope_kernel(%arg0: i32, %arg1: memref<128x256xbf16, #tpu.memory_space<vmem>>, %arg2: memref<256x768xbf16, #tpu.memory_space<vmem>>, %arg3: memref<2x1x128xf32, #tpu.memory_space<vmem>>, %arg4: memref<2x1x128xf32, #tpu.memory_space<vmem>>, %arg5: memref<128x128xf32, #tpu.memory_space<vmem>>, %arg6: memref<128x128xf32, #tpu.memory_space<vmem>>, %arg7: memref<2x128x128xbf16, #tpu.memory_space<vmem>>, %arg8: memref<2x128x128xbf16, #tpu.memory_space<vmem>>, %arg9: memref<2x128x128xbf16, #tpu.memory_space<vmem>>) attributes {dimension_semantics = [#tpu.dimension_semantics<parallel>], iteration_bounds = array<i64: 2>, scalar_prefetch = 0 : i64, scratch_operands = 0 : i64, tpu.core_type = #tpu.core_type<tc>, window_params = [{transform_indices = @transform_0, window_bounds = array<i64: 128, 256>}, {pipeline_mode = #tpu.pipeline_mode<synchronous>, transform_indices = @transform_1, window_bounds = array<i64: 256, 768>}, {pipeline_mode = #tpu.pipeline_mode<synchronous>, transform_indices = @transform_2, window_bounds = array<i64: 2, 1, 128>}, {pipeline_mode = #tpu.pipeline_mode<synchronous>, transform_indices = @transform_3, window_bounds = array<i64: 2, 1, 128>}, {transform_indices = @transform_4, window_bounds = array<i64: 128, 128>}, {transform_indices = @transform_5, window_bounds = array<i64: 128, 128>}, {transform_indices = @transform_6, window_bounds = array<i64: 2, 128, 128>}, {transform_indices = @transform_7, window_bounds = array<i64: 2, 128, 128>}, {transform_indices = @transform_8, window_bounds = array<i64: 2, 128, 128>}]} {
    %c0 = arith.constant 0 : index
    %c0_0 = arith.constant 0 : index
    %0 = vector.load %arg1[%c0, %c0_0] : memref<128x256xbf16, #tpu.memory_space<vmem>>, vector<128x256xbf16>
    %c0_1 = arith.constant 0 : index
    %c0_2 = arith.constant 0 : index
    %1 = vector.load %arg2[%c0_1, %c0_2] : memref<256x768xbf16, #tpu.memory_space<vmem>>, vector<256x768xbf16>
    %cst = arith.constant dense<0.000000e+00> : vector<128x768xf32>
    %2 = tpu.matmul %0, %1, %cst {dimension_numbers = #tpu.dot_dimension_numbers<[1], [0], [0], [1], [0, 0, 1, 1], [], []>} : vector<128x256xbf16>, vector<256x768xbf16>, vector<128x768xf32> -> vector<128x768xf32>
    %c0_3 = arith.constant 0 : index
    %c0_4 = arith.constant 0 : index
    %3 = vector.load %arg5[%c0_3, %c0_4] : memref<128x128xf32, #tpu.memory_space<vmem>>, vector<128x128xf32>
    %c0_5 = arith.constant 0 : index
    %c0_6 = arith.constant 0 : index
    %4 = vector.load %arg6[%c0_5, %c0_6] : memref<128x128xf32, #tpu.memory_space<vmem>>, vector<128x128xf32>
    %5 = vector.extract_strided_slice %2 {offsets = [0, 0], sizes = [128, 128], strides = [1, 1]} : vector<128x768xf32> to vector<128x128xf32>
    %6 = arith.mulf %5, %5 : vector<128x128xf32>
    %cst_7 = arith.constant dense<0.000000e+00> : vector<128xf32>
    %7 = vector.multi_reduction <add>, %6, %cst_7 [1] : vector<128x128xf32> to vector<128xf32>
    %8 = vector.shape_cast %7 : vector<128xf32> to vector<128x1xf32>
    %cst_8 = arith.constant 1.000000e-24 : f32
    %9 = vector.broadcast %cst_8 : f32 to vector<128x1xf32>
    %10 = arith.maximumf %8, %9 : vector<128x1xf32>
    %11 = math.rsqrt %10 : vector<128x1xf32>
    %12 = vector.broadcast %11 : vector<128x1xf32> to vector<128x128xf32>
    %13 = arith.mulf %5, %12 : vector<128x128xf32>
    %c0_9 = arith.constant 0 : index
    %c0_10 = arith.constant 0 : index
    %c0_11 = arith.constant 0 : index
    %14 = vector.load %arg3[%c0_9, %c0_10, %c0_11] : memref<2x1x128xf32, #tpu.memory_space<vmem>>, vector<1x1x128xf32>
    %15 = vector.shape_cast %14 : vector<1x1x128xf32> to vector<1x128xf32>
    %16 = vector.broadcast %15 : vector<1x128xf32> to vector<128x128xf32>
    %17 = arith.mulf %13, %16 : vector<128x128xf32>
    %18 = vector.extract_strided_slice %2 {offsets = [0, 256], sizes = [128, 128], strides = [1, 1]} : vector<128x768xf32> to vector<128x128xf32>
    %19 = arith.mulf %18, %18 : vector<128x128xf32>
    %cst_12 = arith.constant dense<0.000000e+00> : vector<128xf32>
    %20 = vector.multi_reduction <add>, %19, %cst_12 [1] : vector<128x128xf32> to vector<128xf32>
    %21 = vector.shape_cast %20 : vector<128xf32> to vector<128x1xf32>
    %cst_13 = arith.constant 1.000000e-24 : f32
    %22 = vector.broadcast %cst_13 : f32 to vector<128x1xf32>
    %23 = arith.maximumf %21, %22 : vector<128x1xf32>
    %24 = math.rsqrt %23 : vector<128x1xf32>
    %25 = vector.broadcast %24 : vector<128x1xf32> to vector<128x128xf32>
    %26 = arith.mulf %18, %25 : vector<128x128xf32>
    %c0_14 = arith.constant 0 : index
    %c0_15 = arith.constant 0 : index
    %c0_16 = arith.constant 0 : index
    %27 = vector.load %arg4[%c0_14, %c0_15, %c0_16] : memref<2x1x128xf32, #tpu.memory_space<vmem>>, vector<1x1x128xf32>
    %28 = vector.shape_cast %27 : vector<1x1x128xf32> to vector<1x128xf32>
    %29 = vector.broadcast %28 : vector<1x128xf32> to vector<128x128xf32>
    %30 = arith.mulf %26, %29 : vector<128x128xf32>
    %31 = vector.extract_strided_slice %2 {offsets = [0, 512], sizes = [128, 128], strides = [1, 1]} : vector<128x768xf32> to vector<128x128xf32>
    %32 = arith.mulf %17, %3 : vector<128x128xf32>
    %c64_i32 = arith.constant 64 : i32
    %33 = tpu.dynamic_rotate %17 by %c64_i32 dim 1 : vector<128x128xf32>, i32 -> vector<128x128xf32>
    %34 = arith.mulf %33, %4 : vector<128x128xf32>
    %35 = arith.addf %32, %34 : vector<128x128xf32>
    %36 = arith.mulf %30, %3 : vector<128x128xf32>
    %c64_i32_17 = arith.constant 64 : i32
    %37 = tpu.dynamic_rotate %30 by %c64_i32_17 dim 1 : vector<128x128xf32>, i32 -> vector<128x128xf32>
    %38 = arith.mulf %37, %4 : vector<128x128xf32>
    %39 = arith.addf %36, %38 : vector<128x128xf32>
    %40 = arith.truncf %35 : vector<128x128xf32> to vector<128x128xbf16>
    %c0_18 = arith.constant 0 : index
    %c0_19 = arith.constant 0 : index
    %c0_20 = arith.constant 0 : index
    %41 = vector.load %arg7[%c0_18, %c0_19, %c0_20] : memref<2x128x128xbf16, #tpu.memory_space<vmem>>, vector<1x128x128xbf16>
    %42 = vector.shape_cast %41 : vector<1x128x128xbf16> to vector<128x128xbf16>
    %43 = vector.shape_cast %40 : vector<128x128xbf16> to vector<1x128x128xbf16>
    tpu.vector_store %arg7[%c0_18, %c0_19, %c0_20], %43 {strides = array<i32>} : memref<2x128x128xbf16, #tpu.memory_space<vmem>>, vector<1x128x128xbf16>,
    %44 = arith.truncf %39 : vector<128x128xf32> to vector<128x128xbf16>
    %c0_21 = arith.constant 0 : index
    %c0_22 = arith.constant 0 : index
    %c0_23 = arith.constant 0 : index
    %45 = vector.load %arg8[%c0_21, %c0_22, %c0_23] : memref<2x128x128xbf16, #tpu.memory_space<vmem>>, vector<1x128x128xbf16>
    %46 = vector.shape_cast %45 : vector<1x128x128xbf16> to vector<128x128xbf16>
    %47 = vector.shape_cast %44 : vector<128x128xbf16> to vector<1x128x128xbf16>
    tpu.vector_store %arg8[%c0_21, %c0_22, %c0_23], %47 {strides = array<i32>} : memref<2x128x128xbf16, #tpu.memory_space<vmem>>, vector<1x128x128xbf16>,
    %48 = arith.truncf %31 : vector<128x128xf32> to vector<128x128xbf16>
    %c0_24 = arith.constant 0 : index
    %c0_25 = arith.constant 0 : index
    %c0_26 = arith.constant 0 : index
    %49 = vector.load %arg9[%c0_24, %c0_25, %c0_26] : memref<2x128x128xbf16, #tpu.memory_space<vmem>>, vector<1x128x128xbf16>
    %50 = vector.shape_cast %49 : vector<1x128x128xbf16> to vector<128x128xbf16>
    %51 = vector.shape_cast %48 : vector<128x128xbf16> to vector<1x128x128xbf16>
    tpu.vector_store %arg9[%c0_24, %c0_25, %c0_26], %51 {strides = array<i32>} : memref<2x128x128xbf16, #tpu.memory_space<vmem>>, vector<1x128x128xbf16>,
    %52 = vector.extract_strided_slice %2 {offsets = [0, 128], sizes = [128, 128], strides = [1, 1]} : vector<128x768xf32> to vector<128x128xf32>
    %53 = arith.mulf %52, %52 : vector<128x128xf32>
    %cst_27 = arith.constant dense<0.000000e+00> : vector<128xf32>
    %54 = vector.multi_reduction <add>, %53, %cst_27 [1] : vector<128x128xf32> to vector<128xf32>
    %55 = vector.shape_cast %54 : vector<128xf32> to vector<128x1xf32>
    %cst_28 = arith.constant 1.000000e-24 : f32
    %56 = vector.broadcast %cst_28 : f32 to vector<128x1xf32>
    %57 = arith.maximumf %55, %56 : vector<128x1xf32>
    %58 = math.rsqrt %57 : vector<128x1xf32>
    %59 = vector.broadcast %58 : vector<128x1xf32> to vector<128x128xf32>
    %60 = arith.mulf %52, %59 : vector<128x128xf32>
    %c1 = arith.constant 1 : index
    %c0_29 = arith.constant 0 : index
    %c0_30 = arith.constant 0 : index
    %61 = vector.load %arg3[%c1, %c0_29, %c0_30] : memref<2x1x128xf32, #tpu.memory_space<vmem>>, vector<1x1x128xf32>
    %62 = vector.shape_cast %61 : vector<1x1x128xf32> to vector<1x128xf32>
    %63 = vector.broadcast %62 : vector<1x128xf32> to vector<128x128xf32>
    %64 = arith.mulf %60, %63 : vector<128x128xf32>
    %65 = vector.extract_strided_slice %2 {offsets = [0, 384], sizes = [128, 128], strides = [1, 1]} : vector<128x768xf32> to vector<128x128xf32>
    %66 = arith.mulf %65, %65 : vector<128x128xf32>
    %cst_31 = arith.constant dense<0.000000e+00> : vector<128xf32>
    %67 = vector.multi_reduction <add>, %66, %cst_31 [1] : vector<128x128xf32> to vector<128xf32>
    %68 = vector.shape_cast %67 : vector<128xf32> to vector<128x1xf32>
    %cst_32 = arith.constant 1.000000e-24 : f32
    %69 = vector.broadcast %cst_32 : f32 to vector<128x1xf32>
    %70 = arith.maximumf %68, %69 : vector<128x1xf32>
    %71 = math.rsqrt %70 : vector<128x1xf32>
    %72 = vector.broadcast %71 : vector<128x1xf32> to vector<128x128xf32>
    %73 = arith.mulf %65, %72 : vector<128x128xf32>
    %c1_33 = arith.constant 1 : index
    %c0_34 = arith.constant 0 : index
    %c0_35 = arith.constant 0 : index
    %74 = vector.load %arg4[%c1_33, %c0_34, %c0_35] : memref<2x1x128xf32, #tpu.memory_space<vmem>>, vector<1x1x128xf32>
    %75 = vector.shape_cast %74 : vector<1x1x128xf32> to vector<1x128xf32>
    %76 = vector.broadcast %75 : vector<1x128xf32> to vector<128x128xf32>
    %77 = arith.mulf %73, %76 : vector<128x128xf32>
    %78 = vector.extract_strided_slice %2 {offsets = [0, 640], sizes = [128, 128], strides = [1, 1]} : vector<128x768xf32> to vector<128x128xf32>
    %79 = arith.mulf %64, %3 : vector<128x128xf32>
    %c64_i32_36 = arith.constant 64 : i32
    %80 = tpu.dynamic_rotate %64 by %c64_i32_36 dim 1 : vector<128x128xf32>, i32 -> vector<128x128xf32>
    %81 = arith.mulf %80, %4 : vector<128x128xf32>
    %82 = arith.addf %79, %81 : vector<128x128xf32>
    %83 = arith.mulf %77, %3 : vector<128x128xf32>
    %c64_i32_37 = arith.constant 64 : i32
    %84 = tpu.dynamic_rotate %77 by %c64_i32_37 dim 1 : vector<128x128xf32>, i32 -> vector<128x128xf32>
    %85 = arith.mulf %84, %4 : vector<128x128xf32>
    %86 = arith.addf %83, %85 : vector<128x128xf32>
    %87 = arith.truncf %82 : vector<128x128xf32> to vector<128x128xbf16>
    %c1_38 = arith.constant 1 : index
    %c0_39 = arith.constant 0 : index
    %c0_40 = arith.constant 0 : index
    %88 = vector.load %arg7[%c1_38, %c0_39, %c0_40] : memref<2x128x128xbf16, #tpu.memory_space<vmem>>, vector<1x128x128xbf16>
    %89 = vector.shape_cast %88 : vector<1x128x128xbf16> to vector<128x128xbf16>
    %90 = vector.shape_cast %87 : vector<128x128xbf16> to vector<1x128x128xbf16>
    tpu.vector_store %arg7[%c1_38, %c0_39, %c0_40], %90 {strides = array<i32>} : memref<2x128x128xbf16, #tpu.memory_space<vmem>>, vector<1x128x128xbf16>,
    %91 = arith.truncf %86 : vector<128x128xf32> to vector<128x128xbf16>
    %c1_41 = arith.constant 1 : index
    %c0_42 = arith.constant 0 : index
    %c0_43 = arith.constant 0 : index
    %92 = vector.load %arg8[%c1_41, %c0_42, %c0_43] : memref<2x128x128xbf16, #tpu.memory_space<vmem>>, vector<1x128x128xbf16>
    %93 = vector.shape_cast %92 : vector<1x128x128xbf16> to vector<128x128xbf16>
    %94 = vector.shape_cast %91 : vector<128x128xbf16> to vector<1x128x128xbf16>
    tpu.vector_store %arg8[%c1_41, %c0_42, %c0_43], %94 {strides = array<i32>} : memref<2x128x128xbf16, #tpu.memory_space<vmem>>, vector<1x128x128xbf16>,
    %95 = arith.truncf %78 : vector<128x128xf32> to vector<128x128xbf16>
    %c1_44 = arith.constant 1 : index
    %c0_45 = arith.constant 0 : index
    %c0_46 = arith.constant 0 : index
    %96 = vector.load %arg9[%c1_44, %c0_45, %c0_46] : memref<2x128x128xbf16, #tpu.memory_space<vmem>>, vector<1x128x128xbf16>
    %97 = vector.shape_cast %96 : vector<1x128x128xbf16> to vector<128x128xbf16>
    %98 = vector.shape_cast %95 : vector<128x128xbf16> to vector<1x128x128xbf16>
    tpu.vector_store %arg9[%c1_44, %c0_45, %c0_46], %98 {strides = array<i32>} : memref<2x128x128xbf16, #tpu.memory_space<vmem>>, vector<1x128x128xbf16>,
    return
  }
  func.func @transform_0(%arg0: i32) -> (i32, i32) {
    %c0_i32 = arith.constant 0 : i32
    %c0_i32_0 = arith.constant 0 : i32
    return %arg0, %c0_i32 : i32, i32
  }
  func.func @transform_1(%arg0: i32) -> (i32, i32) {
    %c0_i32 = arith.constant 0 : i32
    %c0_i32_0 = arith.constant 0 : i32
    %c0_i32_1 = arith.constant 0 : i32
    return %c0_i32, %c0_i32_0 : i32, i32
  }
  func.func @transform_2(%arg0: i32) -> (i32, i32, i32) {
    %c0_i32 = arith.constant 0 : i32
    %c0_i32_0 = arith.constant 0 : i32
    %c0_i32_1 = arith.constant 0 : i32
    %c0_i32_2 = arith.constant 0 : i32
    return %c0_i32, %c0_i32_0, %c0_i32_1 : i32, i32, i32
  }
  func.func @transform_3(%arg0: i32) -> (i32, i32, i32) {
    %c0_i32 = arith.constant 0 : i32
    %c0_i32_0 = arith.constant 0 : i32
    %c0_i32_1 = arith.constant 0 : i32
    %c0_i32_2 = arith.constant 0 : i32
    return %c0_i32, %c0_i32_0, %c0_i32_1 : i32, i32, i32
  }
  func.func @transform_4(%arg0: i32) -> (i32, i32) {
    %c0_i32 = arith.constant 0 : i32
    %c0_i32_0 = arith.constant 0 : i32
    return %arg0, %c0_i32 : i32, i32
  }
  func.func @transform_5(%arg0: i32) -> (i32, i32) {
    %c0_i32 = arith.constant 0 : i32
    %c0_i32_0 = arith.constant 0 : i32
    return %arg0, %c0_i32 : i32, i32
  }
  func.func @transform_6(%arg0: i32) -> (i32, i32, i32) {
    %c0_i32 = arith.constant 0 : i32
    %c0_i32_0 = arith.constant 0 : i32
    %c0_i32_1 = arith.constant 0 : i32
    return %c0_i32, %arg0, %c0_i32_0 : i32, i32, i32
  }
  func.func @transform_7(%arg0: i32) -> (i32, i32, i32) {
    %c0_i32 = arith.constant 0 : i32
    %c0_i32_0 = arith.constant 0 : i32
    %c0_i32_1 = arith.constant 0 : i32
    return %c0_i32, %arg0, %c0_i32_0 : i32, i32, i32
  }
  func.func @transform_8(%arg0: i32) -> (i32, i32, i32) {
    %c0_i32 = arith.constant 0 : i32
    %c0_i32_0 = arith.constant 0 : i32
    %c0_i32_1 = arith.constant 0 : i32
    return %c0_i32, %arg0, %c0_i32_0 : i32, i32, i32
  }
}

</mosaic_0001>

<bundles_post_ra>
// kernel: tpu_custom_call.1
= control target key start
LH: loop header
LB: loop body
LE: loop exit
PB: predicated region body
PF: predicated region fallthrough
CT: control target
= control target key end

     0   :  { %s5735_s0 = inlined_call_operand.hbm [shape: bf16[256,256], index: 0, kind: input, shape index: {}]   ;;  %s5736_s1 = inlined_call_operand.hbm [shape: bf16[256,768], index: 1, kind: input, shape index: {}]   ;;  %s5737_s2 = inlined_call_operand.vmem [shape: f32[2,1,128], index: 2, kind: input, shape index: {}]   ;;  %s5738_s3 = inlined_call_operand.vmem [shape: f32[2,1,128], index: 3, kind: input, shape index: {}]   ;;  %s5739_s4 = inlined_call_operand.hbm [shape: f32[256,128], index: 4, kind: input, shape index: {}]   ;;  %s5740_s5 = inlined_call_operand.hbm [shape: f32[256,128], index: 5, kind: input, shape index: {}]   ;;  %s5741_s6 = inlined_call_operand.hbm [shape: bf16[2,256,128], index: 6, kind: output, shape index: {0}]   ;;  %s5742_s7 = inlined_call_operand.hbm [shape: bf16[2,256,128], index: 7, kind: output, shape index: {1}]   ;;  %s5743_s8 = inlined_call_operand.hbm [shape: bf16[2,256,128], index: 8, kind: output, shape index: {2}]  }
   0x1   :  { %5801 = sst [smem:[#allocation58_spill]] %s5735_s0 }
   0x2   :  { %5802 = sst [smem:[#allocation59_spill]] %s5739_s4 }
   0x3   :  { %14 = vsyncpa [#allocation3], 0 }
   0x4   :  { %16 = vsyncpa [#allocation3 + $0x1], 0 }
   0x5   :  { %17 = vsyncpa [#allocation6], 0 }
   0x6   :  { %18 = vsyncpa [#allocation4], 0 }
   0x7   :  { %20 = vsyncpa [#allocation4 + $0x1], 0 }
   0x8   :  { %21 = vsyncpa [#allocation11], 0 }
   0x9   :  { %23 = vsyncpa [#allocation11 + $0x1], 0  ;;  %s4466_s27 = smov 0   ;;  %s4468_s28 = smov 0  }
   0xa   :  { %s4470_s29 = smov 0   ;;  %s4472_s30 = smov 0  }
   0xb LB: > { %5803 = sst [smem:[#allocation24_spill]] %s4385_s29  ;;  %s4487_s9 = sadd.s32 1, %s4389_s30   ;;  %s4389_s30 = sphi %s4472_s30, %s5924_s30   ;;  %s4385_s29 = sphi %s4470_s29, %s5921_s29   ;;  %s4381_s28 = sphi %s4468_s28, %s5923_s28   ;;  %s4377_s27 = sphi %s4466_s27, %s5922_s27  }
   0xc   : > { %s36_s10 = sadd.s32 1, %s4385_s29  ;;  %s33_s11 = ssub.s32 %s4389_s30, %s4487_s9 }
   0xd   : > { %p5744_p0 = scmp.ne.s32.totalorder %s4385_s29, %s4381_s28  ;;  %p34_p1 = scmp.eq.s32.totalorder %s33_s11, 0 }
   0xe   : > { %p44_p2 = scmp.eq.s32.totalorder %s4389_s30, 0  ;;  %p3863_p4 = scmp.lt.s32.totalorder %s4389_s30, 2 }
   0xf   : > { %s4498_s12 = scalar_select %p34_p1, %s4385_s29, %s36_s10  }
  0x10   : > { %p45_p5 = por %p44_p2, %p5744_p0  ;;  %s285_s13 = sand.u32 1, %s4389_s30  }
  0x11   : > { %5804 = sst [smem:[#allocation25_spill]] %s4498_s12  ;;  %s287_s14 = sand.u32 1, %s4385_s29  }
  0x12   : > { %s4505_s15 = sshll.u32 %s287_s14, 7  ;;  %s4508_s16 = sshll.u32 %s4389_s30, 11 }
  0x13   : > { %s5805_s0 = sld [smem:[#allocation58_spill]]  ;;  %s289_s20 = scalar_lea.vmem [#allocation2], %s4505_s15 }
  0x14   : > { %s297_s21 = sshll.u32 %s289_s20, 4  ;;  %p4517_p6 = pnand %p3863_p4, %p45_p5  ;;  %s4521_s21 = int_to_ptr.vmem [resolvable:$true] %s297_s21 }
  0x15   : > { %s4523_s23 = scalar_lea.sflag [#allocation3], %s285_s13 }
  0x16   : > { %p4529_p8 = pneg %p4517_p6 }
  0x19   : > { %s4514_s19 = scalar_lea.hbm %s5805_s0, %s4508_s16  ;;  %s4226_s11 = scalar_lea.hbm %s5805_s0, 4096 }
  0x1a   : > { %s4221_s24 = scalar_lea.hbm %s4514_s19, 2048  ;;  %p4227_p11 = scmp.lt.u32.totalorder %s4514_s19, %s5805_s0 }
  0x1b   : > { %p4222_p7 = scmp.ne.s32.totalorder %s4514_s19, %s4221_s24  ;;  %p4228_p12 = scmp.lt.u32.totalorder %s4226_s11, %s4221_s24 }
  0x1c   : > { %p4230_p1 = scmp.lt.u32.totalorder %s4221_s24, %s4514_s19 }
  0x1d   : > { %p4224_p9 = pnand %p4529_p8, %p4222_p7  ;;  %p4229_p13 = por %p4228_p12, %p4227_p11 }
  0x1f   : > { %p4225_p10 = pneg %p4224_p9  ;;  %p4231_p2 = por %p4230_p1, %p4229_p13 }
  0x21   : > { %p4232_p4 = pnand %p4231_p2, %p4225_p10 }
  0x23   : > { %4235 = shalt.err (!%p4232_p4)
}
  0x24   : > { %s4236_s13 = scalar_lea.vmem %s4521_s21, 2048  ;;  %s4391_s18 = smov [#allocation2]  }
  0x25   : > { %p4237_p5 = scmp.ne.s32.totalorder %s4521_s21, %s4236_s13  ;;  %s4241_s20 = sshll.u32 %s4391_s18, 4  ;;  %s4242_s20 = int_to_ptr.vmem [resolvable:$false] %s4241_s20 }
  0x26   : > { %s4243_s26 = scalar_lea.vmem %s4242_s20, 4096  ;;  %p4244_p3 = scmp.lt.s32.totalorder %s4521_s21, %s4242_s20 }
  0x27   : > { %p4239_p7 = pnand %p4237_p5, %p4529_p8  ;;  %p4245_p0 = scmp.lt.s32.totalorder %s4243_s26, %s4236_s13 }
  0x29   : > { %p4240_p9 = pneg %p4239_p7  ;;  %p4246_p11 = por %p4245_p0, %p4244_p3 }
  0x2b   : > { %p4247_p12 = pnand %p4246_p11, %p4240_p9 }
  0x2d   : > { %4250 = shalt.err (!%p4247_p12)
}
  0x2e   : > { %s5746_s24 = smov 128   ;;  %s5747_s10 = smov 8  }
  0x2f   : > { %3845 = dma.hbm_to_vmem [thread:$0]  (!%p4517_p6), %s4514_s19, 2048, %s4521_s21, %s4523_s23, %s5746_s24, %s5746_s24, %s5747_s10  }
  0x30   : > { %s5808_s4 = sld [smem:[#allocation59_spill]]  ;;  %s311_s13 = scalar_lea.vmem [#allocation7], %s4505_s15 }
  0x31   : > { %s318_s18 = sshll.u32 %s311_s13, 4  ;;  %s4563_s18 = int_to_ptr.vmem [resolvable:$true] %s318_s18 }
  0x36   : > { %s4560_s17 = scalar_lea.hbm %s5808_s4, %s4508_s16  ;;  %s4256_s21 = scalar_lea.hbm %s5808_s4, 4096 }
  0x37   : > { %s4251_s20 = scalar_lea.hbm %s4560_s17, 2048  ;;  %p4257_p13 = scmp.lt.u32.totalorder %s4560_s17, %s5808_s4 }
  0x38   : > { %p4252_p0 = scmp.ne.s32.totalorder %s4560_s17, %s4251_s20  ;;  %p4258_p1 = scmp.lt.u32.totalorder %s4256_s21, %s4251_s20 }
  0x39   : > { %p4260_p4 = scmp.lt.u32.totalorder %s4251_s20, %s4560_s17 }
  0x3a   : > { %p4254_p3 = pnand %p4252_p0, %p4529_p8  ;;  %p4259_p2 = por %p4258_p1, %p4257_p13 }
  0x3c   : > { %p4255_p10 = pneg %p4254_p3  ;;  %p4261_p5 = por %p4260_p4, %p4259_p2 }
  0x3e   : > { %p4262_p7 = pnand %p4261_p5, %p4255_p10 }
  0x40   : > { %4265 = shalt.err (!%p4262_p7)
}
  0x41   : > { %s4266_s13 = scalar_lea.vmem %s4563_s18, 2048  ;;  %s4394_s26 = smov [#allocation7]  }
  0x42   : > { %p4267_p9 = scmp.ne.s32.totalorder %s4563_s18, %s4266_s13  ;;  %s4271_s19 = sshll.u32 %s4394_s26, 4  ;;  %s4272_s19 = int_to_ptr.vmem [resolvable:$false] %s4271_s19 }
  0x43   : > { %s4273_s11 = scalar_lea.vmem %s4272_s19, 4096  ;;  %p4274_p0 = scmp.lt.s32.totalorder %s4563_s18, %s4272_s19 }
  0x44   : > { %p4269_p11 = pnand %p4267_p9, %p4529_p8  ;;  %p4275_p3 = scmp.lt.s32.totalorder %s4273_s11, %s4266_s13 }
  0x46   : > { %p4270_p12 = pneg %p4269_p11  ;;  %p4276_p13 = por %p4275_p3, %p4274_p0 }
  0x48   : > { %p4277_p1 = pnand %p4276_p13, %p4270_p12 }
  0x4a   : > { %4280 = shalt.err (!%p4277_p1)
}
  0x4b   : > { %3848 = dma.hbm_to_vmem [thread:$0]  (!%p4517_p6), %s4560_s17, 2048, %s4563_s18, %s4523_s23, %s5746_s24, %s5746_s24, %s5747_s10  }
  0x4c   : > { %s4591_s20 = sadd.s32 4294967295, %s4389_s30   ;;  %s5745_s21 = sadd.s32 4294967294, %s4389_s30  }
  0x4d   : > { %p49_p10 = scmp.ne.s32.totalorder %s4381_s28, %s4377_s27  ;;  %p5749_p2 = scmp.eq.s32.totalorder %s4591_s20, 0 }
  0x4e   : > { %p188_p4 = scmp.eq.s32.totalorder %s4591_s20, 1  ;;  %p194_p5 = scmp.eq.s32.totalorder %s5745_s21, 1 }
  0x4f   : > { %p4602_p7 = por %p5749_p2, %p49_p10  ;;  %p3090_p9 = scmp.ge.s32.totalorder %s4389_s30, 1 }
  0x50   : > { %p5810_p11 = scmp.ne.s32.totalorder %s4385_s29, %s4381_s28  ;;  %p4614_p0 = por %p194_p5, %p49_p10 }
  0x51   : > { %s5809_s14 = scalar_select %p4602_p7, 1, 0 }
  0x52   : > { %p4610_p12 = por %p188_p4, %p5810_p11  ;;  %p253_p3 = scmp.lt.s32.totalorder %s4389_s30, 3 }
  0x53   : > { %s5812_s18 = scalar_select %p4614_p0, 1, 0 }
  0x54   : > { %s5811_s17 = scalar_select %p4610_p12, 1, 0 }
  0x55   : > { %p4619_p13 = pnand %p3090_p9, %p253_p3  ;;  %s4395_s26 = smov [#allocation5]  }
  0x56   : > { %s265_s19 = sshll.u32 %s4395_s26, 4  ;;  %s4631_s24 = scalar_lea.hbm %s5740_s5, %s4508_s16  ;;  %s4623_s19 = int_to_ptr.vmem [resolvable:$true] %s265_s19 }
  0x57   : > { %s5813_s13 = scalar_select %p4619_p13, 1, 0 }
  0x58   : > { %p3838_p1 = pneg %p4619_p13  ;;  %s332_s10 = scalar_lea.vmem [#allocation8], %s4505_s15 }
  0x59   : > { %s339_s0 = sshll.u32 %s332_s10, 4  ;;  %s4281_s26 = scalar_lea.hbm %s4631_s24, 2048  ;;  %s4640_s0 = int_to_ptr.vmem [resolvable:$true] %s339_s0 }
  0x5a   : > { %p4636_p10 = pnand %p3838_p1, %p5749_p2  ;;  %p4282_p4 = scmp.ne.s32.totalorder %s4631_s24, %s4281_s26 }
  0x5b   : > { %s4286_s11 = scalar_lea.hbm %s5740_s5, 4096  ;;  %p4287_p11 = scmp.lt.u32.totalorder %s4631_s24, %s5740_s5 }
  0x5c   : > { %s5814_s4 = scalar_select %p4636_p10, 1, 0 }
  0x5d   : > { %p4284_p5 = pnand %p4282_p4, %p4529_p8  ;;  %p4288_p3 = scmp.lt.u32.totalorder %s4286_s11, %s4281_s26 }
  0x5e   : > { %p4290_p2 = scmp.lt.u32.totalorder %s4281_s26, %s4631_s24 }
  0x5f   : > { %p4285_p9 = pneg %p4284_p5  ;;  %p4289_p1 = por %p4288_p3, %p4287_p11 }
  0x61   : > { %p4291_p0 = por %p4290_p2, %p4289_p1 }
  0x63   : > { %p4292_p12 = pnand %p4291_p0, %p4285_p9 }
  0x65   : > { %4295 = shalt.err (!%p4292_p12)
}
  0x66   : > { %s4296_s15 = scalar_lea.vmem %s4640_s0, 2048  ;;  %s4396_s10 = smov [#allocation8]  }
  0x67   : > { %p4297_p4 = scmp.ne.s32.totalorder %s4640_s0, %s4296_s15  ;;  %s4301_s16 = sshll.u32 %s4396_s10, 4  ;;  %s4302_s16 = int_to_ptr.vmem [resolvable:$false] %s4301_s16 }
  0x68   : > { %s4303_s29 = scalar_lea.vmem %s4302_s16, 4096  ;;  %p4304_p13 = scmp.lt.s32.totalorder %s4640_s0, %s4302_s16 }
  0x69   : > { %p4299_p5 = pnand %p4297_p4, %p4529_p8  ;;  %p4305_p10 = scmp.lt.s32.totalorder %s4303_s29, %s4296_s15 }
  0x6b   : > { %p4300_p7 = pneg %p4299_p5  ;;  %p4306_p11 = por %p4305_p10, %p4304_p13 }
  0x6d   : > { %p4307_p3 = pnand %p4306_p11, %p4300_p7 }
  0x6f   : > { %4310 = shalt.err (!%p4307_p3)
}
  0x70   : > { %s5815_s12 = smov 8   ;;  %s5816_s26 = smov 128  }
  0x71   : > { %3851 = dma.hbm_to_vmem [thread:$0]  (!%p4517_p6), %s4631_s24, 2048, %s4640_s0, %s4523_s23, %s5816_s26, %s5816_s26, %s5815_s12  }
  0x72   : > { %s4311_s11 = scalar_lea.hbm %s5736_s1, 12288  ;;  %p5817_p2 = scmp.ne.s32.totalorder %s5814_s4, 0 }
  0x73   : > { %p4312_p8 = scmp.ne.s32.totalorder %s5736_s1, %s4311_s11  ;;  %p4318_p13 = scmp.lt.u32.totalorder %s4311_s11, %s5736_s1 }
  0x74   : > { %p4313_p7 = pneg %p5817_p2 }
  0x76   : > { %p4314_p12 = pnand %p4313_p7, %p4312_p8 }
  0x78   : > { %p4315_p0 = pneg %p4314_p12 }
  0x7a   : > { %p4320_p10 = pnand %p4318_p13, %p4315_p0 }
  0x7c   : > { %4323 = shalt.err (!%p4320_p10)
}
  0x7d   : > { %s4324_s0 = scalar_lea.vmem %s4623_s19, 12288  ;;  %p4332_p4 = scmp.lt.s32.totalorder %s4623_s19, %s4623_s19 }
  0x7e   : > { %p4325_p6 = scmp.ne.s32.totalorder %s4623_s19, %s4324_s0  ;;  %p4333_p5 = scmp.lt.s32.totalorder %s4324_s0, %s4324_s0 }
  0x80   : > { %p4327_p9 = pnand %p4325_p6, %p4313_p7  ;;  %p4334_p11 = por %p4333_p5, %p4332_p4 }
  0x82   : > { %p4328_p1 = pneg %p4327_p9 }
  0x84   : > { %p4335_p3 = pnand %p4334_p11, %p4328_p1 }
  0x86   : > { %4338 = shalt.err (!%p4335_p3)
}
  0x87   : > { %s4397_s23 = smov 384   ;;  %s4398_s24 = smov 24  }
  0x88   : > { %3841 = dma.hbm_to_vmem [thread:$0]  (!%p5817_p2), %s5736_s1, 12288, %s4623_s19, [#allocation6], %s4397_s23, %s4397_s23, %s4398_s24  }
  0x89   : > { %p5818_p8 = scmp.ne.s32.totalorder %s5813_s13, 0 }
  0x8b   : > { %351 = sbr.rel (%p5818_p8) target bundleno = 886 (0x376), region = 44 }
  0x92   : > { %s353_s26 = sand.u32 1, %s4591_s20   ;;  %s355_s25 = sand.u32 1, %s4381_s28  }
  0x93   : > { %s4694_s21 = sshll.u32 %s355_s25, 7  ;;  %s354_s4 = scalar_lea.sflag [#allocation3], %s353_s26 }
  0x94   : > { %s4699_s11 = scalar_lea.vmem [#allocation2], %s4694_s21  ;;  %p5819_p7 = scmp.ne.s32.totalorder %s5809_s14, 0 }
  0x96   : > { %4356 = dma.done.wait (%p5819_p7), %s354_s4, 2048  }
  0x97   : > { %4358 = vsyncadd (%p5819_p7), %s354_s4, 4294965248  ;;  %p5820_p2 = scmp.eq.s32.totalorder %s4591_s20, 0 }
  0x99   : > { %4360 = dma.done.wait (%p5820_p2), [#allocation6], 12288   ;;  %p5821_p12 = pmov %p5820_p2 }
  0x9a   : > { %s4710_s13 = scalar_lea.vmem [#allocation7], %s4694_s21 }
  0x9b   : > { %4362 = vsyncadd (%p5821_p12), [#allocation6], 4294955008 }
  0x9c   : > { %4364 = dma.done.wait (%p5819_p7), %s354_s4, 4096  }
  0x9d   : > { %4366 = vsyncadd (%p5819_p7), %s354_s4, 4294963200  ;;  %v3925_v0 = vld [vmem:[#allocation5 + $0x4] ss:$24 sps:$4 sm:$0xff]   ;;  %v3927_v1 = vld [vmem:[#allocation5] ss:$24 sps:$4 sm:$0xff]   ;;  %s4399_s22 = smov 64  }
  0x9e   : > { %1110 = vmatprep.subr.bf16.mxu0 %v3925_v0  ;;  %v3928_v2 = vld [vmem:[#allocation5 + $0xc] ss:$24 sps:$4 sm:$0xff]   ;;  %v3930_v3 = vld [vmem:[#allocation5 + $0x8] ss:$24 sps:$4 sm:$0xff]   ;;  %v3934_v6 = vld [vmem:[#allocation5 + $0x3c] ss:$24 sps:$4 sm:$0xff]  }
  0x9f   : > { %1111 = vmatpush1.bf16.msra.mxu0 %v3927_v1  ;;  %v3931_v4 = vld [vmem:[#allocation5 + $0x34] ss:$24 sps:$4 sm:$0xff]   ;;  %v3933_v5 = vld [vmem:[#allocation5 + $0x30] ss:$24 sps:$4 sm:$0xff]   ;;  %1223 = vmatprep.subr.bf16.mxu1 %v3928_v2  ;;  %v3937_v8 = vld [vmem:[#allocation5 + $0x64] ss:$24 sps:$4 sm:$0xff]  }
  0xa0   : > { %1224 = vmatpush1.bf16.msra.mxu1 %v3930_v3  ;;  %1112 = vmatprep.subr.bf16.mxu0 %v3931_v4  ;;  %v3936_v7 = vld [vmem:[#allocation5 + $0x38] ss:$24 sps:$4 sm:$0xff]   ;;  %v3940_v10 = vld [vmem:[#allocation5 + $0x6c] ss:$24 sps:$4 sm:$0xff]   ;;  %v3942_v12 = vld [vmem:[#allocation5 + $0x68] ss:$24 sps:$4 sm:$0xff]  }
  0xa1   : > { %1225 = vmatprep.subr.bf16.mxu1 %v3934_v6  ;;  %v3939_v9 = vld [vmem:[#allocation5 + $0x60] ss:$24 sps:$4 sm:$0xff]   ;;  %v3943_v11 = vld [vmem:[#allocation5 + $0x94] ss:$24 sps:$4 sm:$0xff]   ;;  %v3945_v14 = vld [vmem:[#allocation5 + $0x90] ss:$24 sps:$4 sm:$0xff]  }
  0xa2   : > { %v3946_v13 = vld [vmem:[#allocation5 + $0x9c] ss:$24 sps:$4 sm:$0xff]   ;;  %v3948_v16 = vld [vmem:[#allocation5 + $0x98] ss:$24 sps:$4 sm:$0xff]   ;;  %v3952_v17 = vld [vmem:[#allocation5 + $0xcc] ss:$24 sps:$4 sm:$0xff]  }
  0xa3   : > { %1113 = vmatpush1.bf16.msra.mxu0 %v3933_v5  ;;  %v3949_v15 = vld [vmem:[#allocation5 + $0xc4] ss:$24 sps:$4 sm:$0xff]   ;;  %v3951_v18 = vld [vmem:[#allocation5 + $0xc0] ss:$24 sps:$4 sm:$0xff]   ;;  %v3955_v19 = vld [vmem:[#allocation5 + $0xf4] ss:$24 sps:$4 sm:$0xff]  }
  0xa4   : > { %1114 = vmatprep.subr.bf16.mxu0 %v3937_v8  ;;  %1226 = vmatpush1.bf16.msra.mxu1 %v3936_v7  ;;  %v3954_v20 = vld [vmem:[#allocation5 + $0xc8] ss:$24 sps:$4 sm:$0xff]   ;;  %v3958_v21 = vld [vmem:[#allocation5 + $0xfc] ss:$24 sps:$4 sm:$0xff]   ;;  %v3960_v24 = vld [vmem:[#allocation5 + $0xf8] ss:$24 sps:$4 sm:$0xff]  }
  0xa5   : > { %1227 = vmatprep.subr.bf16.mxu1 %v3940_v10  ;;  %v3957_v22 = vld [vmem:[#allocation5 + $0xf0] ss:$24 sps:$4 sm:$0xff]   ;;  %v3961_v23 = vld [vmem:[#allocation5 + $0x124] ss:$24 sps:$4 sm:$0xff]   ;;  %v3963_v26 = vld [vmem:[#allocation5 + $0x120] ss:$24 sps:$4 sm:$0xff]  }
  0xa6   : > { %v3964_v25 = vld [vmem:[#allocation5 + $0x12c] ss:$24 sps:$4 sm:$0xff]   ;;  %v3966_v28 = vld [vmem:[#allocation5 + $0x128] ss:$24 sps:$4 sm:$0xff]   ;;  %v3970_v29 = vld [vmem:[#allocation5 + $0x15c] ss:$24 sps:$4 sm:$0xff]  }
  0xa7   : > { %1115 = vmatpush1.bf16.msra.mxu0 %v3939_v9  ;;  %v3967_v27 = vld [vmem:[#allocation5 + $0x154] ss:$24 sps:$4 sm:$0xff]   ;;  %v3969_v30 = vld [vmem:[#allocation5 + $0x150] ss:$24 sps:$4 sm:$0xff]   ;;  %v3973_v31 = vld [vmem:[#allocation5 + $0x184] ss:$24 sps:$4 sm:$0xff]  }
  0xa8   : > { %1116 = vmatprep.subr.bf16.mxu0 %v3943_v11  ;;  %1228 = vmatpush1.bf16.msra.mxu1 %v3942_v12  ;;  %v3972_v32 = vld [vmem:[#allocation5 + $0x158] ss:$24 sps:$4 sm:$0xff]   ;;  %v3976_v33 = vld [vmem:[#allocation5 + $0x18c] ss:$24 sps:$4 sm:$0xff]   ;;  %v3978_v36 = vld [vmem:[#allocation5 + $0x188] ss:$24 sps:$4 sm:$0xff]  }
  0xa9   : > { %1229 = vmatprep.subr.bf16.mxu1 %v3946_v13  ;;  %v3975_v34 = vld [vmem:[#allocation5 + $0x180] ss:$24 sps:$4 sm:$0xff]   ;;  %v3979_v35 = vld [vmem:[#allocation5 + $0x1b4] ss:$24 sps:$4 sm:$0xff]   ;;  %v3981_v38 = vld [vmem:[#allocation5 + $0x1b0] ss:$24 sps:$4 sm:$0xff]  }
  0xaa   : > { %v3982_v37 = vld [vmem:[#allocation5 + $0x1bc] ss:$24 sps:$4 sm:$0xff]   ;;  %v3984_v40 = vld [vmem:[#allocation5 + $0x1b8] ss:$24 sps:$4 sm:$0xff]   ;;  %v3988_v41 = vld [vmem:[#allocation5 + $0x1ec] ss:$24 sps:$4 sm:$0xff]  }
  0xab   : > { %1117 = vmatpush1.bf16.msra.mxu0 %v3945_v14  ;;  %v3985_v39 = vld [vmem:[#allocation5 + $0x1e4] ss:$24 sps:$4 sm:$0xff]   ;;  %v3987_v42 = vld [vmem:[#allocation5 + $0x1e0] ss:$24 sps:$4 sm:$0xff]   ;;  %v3991_v43 = vld [vmem:[#allocation5 + $0x214] ss:$24 sps:$4 sm:$0xff]  }
  0xac   : > { %1118 = vmatprep.subr.bf16.mxu0 %v3949_v15  ;;  %1230 = vmatpush1.bf16.msra.mxu1 %v3948_v16  ;;  %v3990_v44 = vld [vmem:[#allocation5 + $0x1e8] ss:$24 sps:$4 sm:$0xff]   ;;  %v3994_v45 = vld [vmem:[#allocation5 + $0x21c] ss:$24 sps:$4 sm:$0xff]   ;;  %v4717_v47 = vld [vmem:[%s4699_s11 + $0x4] ss:$8 sps:$4 sm:$0xff]  }
  0xad   : > { %1231 = vmatprep.subr.bf16.mxu1 %v3952_v17  ;;  %v3993_v46 = vld [vmem:[#allocation5 + $0x210] ss:$24 sps:$4 sm:$0xff]   ;;  %v3997_v48 = vld [vmem:[#allocation5 + $0x244] ss:$24 sps:$4 sm:$0xff]   ;;  %1142 = vmatprep.mubr.bf16.mxu0 %v4717_v47  ;;  %v3999_v51 = vld [vmem:[#allocation5 + $0x240] ss:$24 sps:$4 sm:$0xff]  }
  0xae   : > { %v3996_v49 = vld [vmem:[#allocation5 + $0x218] ss:$24 sps:$4 sm:$0xff]   ;;  %v4000_v50 = vld [vmem:[#allocation5 + $0x24c] ss:$24 sps:$4 sm:$0xff]   ;;  %1255 = vmatprep.mubr.bf16.mxu1 %v4717_v47  ;;  %v4002_v53 = vld [vmem:[#allocation5 + $0x248] ss:$24 sps:$4 sm:$0xff]  }
  0xaf   : > { %1119 = vmatpush1.bf16.msra.mxu0 %v3951_v18  ;;  %v4003_v52 = vld [vmem:[#allocation5 + $0x274] ss:$24 sps:$4 sm:$0xff]   ;;  %v4005_v55 = vld [vmem:[#allocation5 + $0x270] ss:$24 sps:$4 sm:$0xff]   ;;  %v4009_v57 = vld [vmem:[#allocation5 + $0x2a4] ss:$24 sps:$4 sm:$0xff]  }
  0xb0   : > { %1120 = vmatprep.subr.bf16.mxu0 %v3955_v19  ;;  %1232 = vmatpush1.bf16.msra.mxu1 %v3954_v20  ;;  %v4006_v54 = vld [vmem:[#allocation5 + $0x27c] ss:$24 sps:$4 sm:$0xff]   ;;  %v4008_v56 = vld [vmem:[#allocation5 + $0x278] ss:$24 sps:$4 sm:$0xff]   ;;  %v4012_v59 = vld [vmem:[#allocation5 + $0x2ac] ss:$24 sps:$4 sm:$0xff]  }
  0xb1   : > { %1233 = vmatprep.subr.bf16.mxu1 %v3958_v21  ;;  %v4011_v58 = vld [vmem:[#allocation5 + $0x2a0] ss:$24 sps:$4 sm:$0xff]   ;;  %v4015_v60 = vld [vmem:[#allocation5 + $0x2d4] ss:$24 sps:$4 sm:$0xff]   ;;  %v4017_v63 = vld [vmem:[#allocation5 + $0x2d0] ss:$24 sps:$4 sm:$0xff]  }
  0xb2   : > { %v4014_v61 = vld [vmem:[#allocation5 + $0x2a8] ss:$24 sps:$4 sm:$0xff]   ;;  %v4018_v62 = vld [vmem:[#allocation5 + $0x2dc] ss:$24 sps:$4 sm:$0xff]   ;;  %v4020_v0 = vld [vmem:[#allocation5 + $0x2d8] ss:$24 sps:$4 sm:$0xff]  }
  0xb3   : > { %1121 = vmatpush1.bf16.msra.mxu0 %v3957_v22  ;;  %v4722_v1 = vld [vmem:[%s4699_s11] ss:$8 sps:$4 sm:$0xff]   ;;  %v4725_v2 = vld [vmem:[%s4699_s11 + $0x14] ss:$8 sps:$4 sm:$0xff]   ;;  %v4732_v3 = vld [vmem:[%s4699_s11 + $0x10] ss:$8 sps:$4 sm:$0xff]  }
  0xb4   : > { %1122 = vmatprep.subr.bf16.mxu0 %v3961_v23  ;;  %1234 = vmatpush1.bf16.msra.mxu1 %v3960_v24  ;;  %v4735_v4 = vld [vmem:[%s4699_s11 + $0x24] ss:$8 sps:$4 sm:$0xff]   ;;  %v4742_v5 = vld [vmem:[%s4699_s11 + $0x20] ss:$8 sps:$4 sm:$0xff]   ;;  %v4745_v6 = vld [vmem:[%s4699_s11 + $0x34] ss:$8 sps:$4 sm:$0xff]  }
  0xb5   : > { %1235 = vmatprep.subr.bf16.mxu1 %v3964_v25  ;;  %v4752_v7 = vld [vmem:[%s4699_s11 + $0x30] ss:$8 sps:$4 sm:$0xff]   ;;  %v4033_v8 = vld [vmem:[%s4699_s11 + $0x44] ss:$8 sps:$4 sm:$0xff]   ;;  %v4758_v9 = vld [vmem:[%s4699_s11 + $0x40] ss:$8 sps:$4 sm:$0xff]  }
  0xb6   : > { %v4761_v10 = vld [vmem:[%s4699_s11 + $0x54] ss:$8 sps:$4 sm:$0xff]   ;;  %v4768_v11 = vld [vmem:[%s4699_s11 + $0x50] ss:$8 sps:$4 sm:$0xff]   ;;  %v4771_v12 = vld [vmem:[%s4699_s11 + $0x64] ss:$8 sps:$4 sm:$0xff]  }
  0xb7   : > { %1123 = vmatpush1.bf16.msra.mxu0 %v3963_v26  ;;  %v4778_v13 = vld [vmem:[%s4699_s11 + $0x60] ss:$8 sps:$4 sm:$0xff]   ;;  %v4781_v14 = vld [vmem:[%s4699_s11 + $0x74] ss:$8 sps:$4 sm:$0xff]   ;;  %v4788_v15 = vld [vmem:[%s4699_s11 + $0x70] ss:$8 sps:$4 sm:$0xff]  }
  0xb8   : > { %1124 = vmatprep.subr.bf16.mxu0 %v3967_v27  ;;  %1236 = vmatpush1.bf16.msra.mxu1 %v3966_v28  ;;  %v4045_v16 = vld [vmem:[#allocation5 + $0x10] ss:$24 sps:$4 sm:$0xff]   ;;  %v4047_v17 = vld [vmem:[#allocation5 + $0x14] ss:$24 sps:$4 sm:$0xff]   ;;  %v4048_v18 = vld [vmem:[#allocation5 + $0x40] ss:$24 sps:$4 sm:$0xff]  }
  0xb9   : > { %1237 = vmatprep.subr.bf16.mxu1 %v3970_v29  ;;  %v4050_v19 = vld [vmem:[#allocation5 + $0x44] ss:$24 sps:$4 sm:$0xff]   ;;  %v4051_v20 = vld [vmem:[#allocation5 + $0x70] ss:$24 sps:$4 sm:$0xff]   ;;  %v4053_v21 = vld [vmem:[#allocation5 + $0x74] ss:$24 sps:$4 sm:$0xff]  }
  0xba   : > { %v4054_v22 = vld [vmem:[#allocation5 + $0xa0] ss:$24 sps:$4 sm:$0xff]   ;;  %v4056_v23 = vld [vmem:[#allocation5 + $0xa4] ss:$24 sps:$4 sm:$0xff]   ;;  %v4057_v24 = vld [vmem:[#allocation5 + $0xd0] ss:$24 sps:$4 sm:$0xff]  }
  0xbb   : > { %1125 = vmatpush1.bf16.msra.mxu0 %v3969_v30  ;;  %v4059_v25 = vld [vmem:[#allocation5 + $0xd4] ss:$24 sps:$4 sm:$0xff]   ;;  %s5388_s29 = scalar_lea.vmem [#allocation12], %s4694_s21  ;;  %s5428_s12 = scalar_lea.vmem [#allocation8], %s4694_s21 }
  0xbc   : > { %1126 = vmatprep.subr.bf16.mxu0 %v3973_v31  ;;  %1238 = vmatpush1.bf16.msra.mxu1 %v3972_v32  ;;  %s5495_s4 = scalar_lea.vmem [#allocation9], %s4694_s21  ;;  %s5512_s11 = scalar_lea.vmem [#allocation10], %s4694_s21 }
  0xbd   : > { %1239 = vmatprep.subr.bf16.mxu1 %v3976_v33  ;;  %s2763_s21 = scalar_lea.sflag [#allocation4], %s355_s25 }
  0xbf   : > { %1127 = vmatpush1.bf16.msra.mxu0 %v3975_v34 }
  0xc0   : > { %1128 = vmatprep.subr.bf16.mxu0 %v3979_v35  ;;  %1240 = vmatpush1.bf16.msra.mxu1 %v3978_v36  ;;  %v4060_v35 = vld [vmem:[#allocation5 + $0x100] ss:$24 sps:$4 sm:$0xff]   ;;  %v4062_v36 = vld [vmem:[#allocation5 + $0x104] ss:$24 sps:$4 sm:$0xff]  }
  0xc1   : > { %1241 = vmatprep.subr.bf16.mxu1 %v3982_v37 }
  0xc3   : > { %1129 = vmatpush1.bf16.msra.mxu0 %v3981_v38 }
  0xc4   : > { %1130 = vmatprep.subr.bf16.mxu0 %v3985_v39  ;;  %1242 = vmatpush1.bf16.msra.mxu1 %v3984_v40  ;;  %v4065_v40 = vld [vmem:[#allocation5 + $0x134] ss:$24 sps:$4 sm:$0xff]  }
  0xc5   : > { %1243 = vmatprep.subr.bf16.mxu1 %v3988_v41  ;;  %v4063_v41 = vld [vmem:[#allocation5 + $0x130] ss:$24 sps:$4 sm:$0xff]  }
  0xc7   : > { %1131 = vmatpush1.bf16.msra.mxu0 %v3987_v42 }
  0xc8   : > { %1132 = vmatprep.subr.bf16.mxu0 %v3991_v43  ;;  %1244 = vmatpush1.bf16.msra.mxu1 %v3990_v44 }
  0xc9   : > { %1245 = vmatprep.subr.bf16.mxu1 %v3994_v45  ;;  %v4068_v45 = vld [vmem:[#allocation5 + $0x164] ss:$24 sps:$4 sm:$0xff]  }
  0xcb   : > { %1133 = vmatpush1.bf16.msra.mxu0 %v3993_v46 }
  0xcc   : > { %1134 = vmatprep.subr.bf16.mxu0 %v3997_v48  ;;  %1246 = vmatpush1.bf16.msra.mxu1 %v3996_v49 }
  0xcd   : > { %1247 = vmatprep.subr.bf16.mxu1 %v4000_v50 }
  0xcf   : > { %1135 = vmatpush1.bf16.msra.mxu0 %v3999_v51  ;;  %v4066_v51 = vld [vmem:[#allocation5 + $0x160] ss:$24 sps:$4 sm:$0xff]  }
  0xd0   : > { %1136 = vmatprep.subr.bf16.mxu0 %v4003_v52  ;;  %1248 = vmatpush1.bf16.msra.mxu1 %v4002_v53 }
  0xd1   : > { %1249 = vmatprep.subr.bf16.mxu1 %v4006_v54 }
  0xd3   : > { %1137 = vmatpush1.bf16.msra.mxu0 %v4005_v55 }
  0xd4   : > { %1138 = vmatprep.subr.bf16.mxu0 %v4009_v57  ;;  %1250 = vmatpush1.bf16.msra.mxu1 %v4008_v56 }
  0xd5   : > { %1251 = vmatprep.subr.bf16.mxu1 %v4012_v59 }
  0xd7   : > { %1139 = vmatpush1.bf16.msra.mxu0 %v4011_v58 }
  0xd8   : > { %1140 = vmatprep.subr.bf16.mxu0 %v4015_v60  ;;  %1252 = vmatpush1.bf16.msra.mxu1 %v4014_v61 }
  0xd9   : > { %1253 = vmatprep.subr.bf16.mxu1 %v4018_v62  ;;  %v4071_v62 = vld [vmem:[#allocation5 + $0x194] ss:$24 sps:$4 sm:$0xff]  }
  0xdb   : > { %1141 = vmatpush1.bf16.msra.mxu0 %v4017_v63 }
  0xdc   : > { %1254 = vmatpush1.bf16.msra.mxu1 %v4020_v0  ;;  %1336 = vmatprep.subr.bf16.mxu0 %v4047_v17 }
  0xdd   : > { %3772 = vmatprep.subr.bf16.mxu1 %v4047_v17 }
  0xde   : > { %1143 = vmatmul.mubr.bf16.vlgmr.msra.gmra.mrb[0].mxu0 %v4722_v1 }
  0xdf   : > { %1152 = vmatprep.mubr.bf16.mxu0 %v4725_v2  ;;  %1256 = vmatmul.mubr.bf16.vlgmr.msra.gmra.mrb[0].mxu1 %v4722_v1 }
  0xe0   : > { %1265 = vmatprep.mubr.bf16.mxu1 %v4725_v2  ;;  %1337 = vmatpush1.bf16.msra.mxu0 %v4045_v16 }
  0xe1   : > { %3788 = vmatpush1.bf16.msra.mxu1 %v4045_v16  ;;  %1338 = vmatprep.subr.bf16.mxu0 %v4050_v19  ;;  %v4069_v16 = vld [vmem:[#allocation5 + $0x190] ss:$24 sps:$4 sm:$0xff]  }
  0xe2   : > { %3773 = vmatprep.subr.bf16.mxu1 %v4050_v19 }
  0xe4   : > { %1339 = vmatpush1.bf16.msra.mxu0 %v4048_v18 }
  0xe5   : > { %3789 = vmatpush1.bf16.msra.mxu1 %v4048_v18  ;;  %1340 = vmatprep.subr.bf16.mxu0 %v4053_v21 }
  0xe6   : > { %1153 = vmatmul.mubr.bf16.gmra.mrb[4].mxu0 %v4732_v3  ;;  %3774 = vmatprep.subr.bf16.mxu1 %v4053_v21 }
  0xe7   : > { %1162 = vmatprep.mubr.bf16.mxu0 %v4735_v4  ;;  %1266 = vmatmul.mubr.bf16.gmra.mrb[4].mxu1 %v4732_v3 }
  0xe8   : > { %1275 = vmatprep.mubr.bf16.mxu1 %v4735_v4  ;;  %1341 = vmatpush1.bf16.msra.mxu0 %v4051_v20 }
  0xe9   : > { %3790 = vmatpush1.bf16.msra.mxu1 %v4051_v20  ;;  %1342 = vmatprep.subr.bf16.mxu0 %v4056_v23  ;;  %v4074_v20 = vld [vmem:[#allocation5 + $0x1c4] ss:$24 sps:$4 sm:$0xff]  }
  0xea   : > { %3775 = vmatprep.subr.bf16.mxu1 %v4056_v23 }
  0xec   : > { %1343 = vmatpush1.bf16.msra.mxu0 %v4054_v22 }
  0xed   : > { %3791 = vmatpush1.bf16.msra.mxu1 %v4054_v22  ;;  %1344 = vmatprep.subr.bf16.mxu0 %v4059_v25  ;;  %v4072_v22 = vld [vmem:[#allocation5 + $0x1c0] ss:$24 sps:$4 sm:$0xff]  }
  0xee   : > { %1163 = vmatmul.mubr.bf16.gmra.mrb[8].mxu0 %v4742_v5  ;;  %3776 = vmatprep.subr.bf16.mxu1 %v4059_v25 }
  0xef   : > { %1172 = vmatprep.mubr.bf16.mxu0 %v4745_v6  ;;  %1276 = vmatmul.mubr.bf16.gmra.mrb[8].mxu1 %v4742_v5 }
  0xf0   : > { %1285 = vmatprep.mubr.bf16.mxu1 %v4745_v6  ;;  %1345 = vmatpush1.bf16.msra.mxu0 %v4057_v24 }
  0xf1   : > { %3792 = vmatpush1.bf16.msra.mxu1 %v4057_v24  ;;  %1346 = vmatprep.subr.bf16.mxu0 %v4062_v36 }
  0xf2   : > { %3777 = vmatprep.subr.bf16.mxu1 %v4062_v36 }
  0xf4   : > { %1347 = vmatpush1.bf16.msra.mxu0 %v4060_v35 }
  0xf5   : > { %3793 = vmatpush1.bf16.msra.mxu1 %v4060_v35  ;;  %1348 = vmatprep.subr.bf16.mxu0 %v4065_v40 }
  0xf6   : > { %1173 = vmatmul.mubr.bf16.gmra.mrb[12].mxu0 %v4752_v7  ;;  %3778 = vmatprep.subr.bf16.mxu1 %v4065_v40 }
  0xf7   : > { %1182 = vmatprep.mubr.bf16.mxu0 %v4033_v8  ;;  %1286 = vmatmul.mubr.bf16.gmra.mrb[12].mxu1 %v4752_v7 }
  0xf8   : > { %1295 = vmatprep.mubr.bf16.mxu1 %v4033_v8  ;;  %1349 = vmatpush1.bf16.msra.mxu0 %v4063_v41 }
  0xf9   : > { %3794 = vmatpush1.bf16.msra.mxu1 %v4063_v41  ;;  %1350 = vmatprep.subr.bf16.mxu0 %v4068_v45 }
  0xfa   : > { %3779 = vmatprep.subr.bf16.mxu1 %v4068_v45 }
  0xfc   : > { %1351 = vmatpush1.bf16.msra.mxu0 %v4066_v51 }
  0xfd   : > { %3795 = vmatpush1.bf16.msra.mxu1 %v4066_v51  ;;  %1352 = vmatprep.subr.bf16.mxu0 %v4071_v62  ;;  %v4078_v51 = vld [vmem:[#allocation5 + $0x220] ss:$24 sps:$4 sm:$0xff]  }
  0xfe   : > { %1183 = vmatmul.mubr.bf16.gmra.mrb[16].mxu0 %v4758_v9  ;;  %3780 = vmatprep.subr.bf16.mxu1 %v4071_v62 }
  0xff   : > { %1192 = vmatprep.mubr.bf16.mxu0 %v4761_v10  ;;  %1296 = vmatmul.mubr.bf16.gmra.mrb[16].mxu1 %v4758_v9 }
 0x100   : > { %1305 = vmatprep.mubr.bf16.mxu1 %v4761_v10  ;;  %1353 = vmatpush1.bf16.msra.mxu0 %v4069_v16 }
 0x101   : > { %3796 = vmatpush1.bf16.msra.mxu1 %v4069_v16  ;;  %1354 = vmatprep.subr.bf16.mxu0 %v4074_v20  ;;  %v4083_v16 = vld [vmem:[#allocation5 + $0x254] ss:$24 sps:$4 sm:$0xff]  }
 0x102   : > { %3781 = vmatprep.subr.bf16.mxu1 %v4074_v20 }
 0x104   : > { %1355 = vmatpush1.bf16.msra.mxu0 %v4072_v22 }
 0x105   : > { %3797 = vmatpush1.bf16.msra.mxu1 %v4072_v22  ;;  %v4081_v22 = vld [vmem:[#allocation5 + $0x250] ss:$24 sps:$4 sm:$0xff]  }
 0x106   : > { %1193 = vmatmul.mubr.bf16.gmra.mrb[20].mxu0 %v4768_v11 }
 0x107   : > { %1202 = vmatprep.mubr.bf16.mxu0 %v4771_v12  ;;  %1306 = vmatmul.mubr.bf16.gmra.mrb[20].mxu1 %v4768_v11 }
 0x108   : > { %1315 = vmatprep.mubr.bf16.mxu1 %v4771_v12 }
 0x10e   : > { %1203 = vmatmul.mubr.bf16.gmra.mrb[24].mxu0 %v4778_v13 }
 0x10f   : > { %1212 = vmatprep.mubr.bf16.mxu0 %v4781_v14  ;;  %1316 = vmatmul.mubr.bf16.gmra.mrb[24].mxu1 %v4778_v13 }
 0x110   : > { %1325 = vmatprep.mubr.bf16.mxu1 %v4781_v14 }
 0x116   : > { %1213 = vmatmul.mubr.bf16.gmra.mrb[28].mxu0 %v4788_v15 }
 0x117   : > { %1368 = vmatprep.mubr.bf16.mxu0 %v4717_v47  ;;  %1326 = vmatmul.mubr.bf16.gmra.mrb[28].mxu1 %v4788_v15 }
 0x118   : > { %1408 = vmatprep.mubr.bf16.mxu1 %v4033_v8 }
 0x1b1   : > { %v4793_v26 = vpop.f32.mrb[0].mxu0 }
 0x1b2   : > { %v4795_v27 = vpop.f32.mrb[1].mxu0  ;;  %v1481_v28 = vmul.f32 %v4793_v26, %v4793_v26  ;;  %v4799_v29 = vpop.f32.mrb[0].mxu1 }
 0x1b3   : > { %v4801_v30 = vpop.f32.mrb[2].mxu0  ;;  %v2119_v31 = vmul.f32 %v4795_v27, %v4795_v27  ;;  %v4805_v32 = vpop.f32.mrb[1].mxu1  ;;  %v1600_v34 = vmul.f32 %v4799_v29, %v4799_v29 }
 0x1b4   : > { %1497 = vadd.xlane.f32.xlu0 %v1481_v28  ;;  %v4807_v33 = vpop.f32.mrb[3].mxu0  ;;  %v4811_v37 = vpop.f32.mrb[2].mxu1  ;;  %v2239_v38 = vmul.f32 %v4805_v32, %v4805_v32  ;;  %v1482_v43 = vmul.f32 %v4801_v30, %v4801_v30 }
 0x1b5   : > { %2135 = vadd.xlane.f32.xlu1 %v2119_v31  ;;  %v4815_v39 = vpop.f32.mrb[3].mxu1  ;;  %v1601_v46 = vmul.f32 %v4811_v37, %v4811_v37  ;;  %v2120_v54 = vmul.f32 %v4807_v33, %v4807_v33 }
 0x1b6   : > { %v2240_v58 = vmul.f32 %v4815_v39, %v4815_v39 }
 0x1b8   : > { %1616 = vadd.xlane.f32.xlu0 %v1600_v34  ;;  %v4077_v34 = vld [vmem:[#allocation5 + $0x1f4] ss:$24 sps:$4 sm:$0xff]  }
 0x1b9   : > { %2255 = vadd.xlane.f32.xlu1 %v2239_v38  ;;  %v4817_v42 = vpop.f32.mrb[4].mxu0  ;;  %v4075_v38 = vld [vmem:[#allocation5 + $0x1f0] ss:$24 sps:$4 sm:$0xff]   ;;  %1356 = vmatprep.subr.bf16.mxu0 %v4077_v34 }
 0x1ba   : > { %v4821_v44 = vpop.f32.mrb[5].mxu0  ;;  %v4825_v47 = vpop.f32.mrb[4].mxu1  ;;  %v1483_v52 = vmul.f32 %v4817_v42, %v4817_v42  ;;  %3782 = vmatprep.subr.bf16.mxu1 %v4077_v34  ;;  %1357 = vmatpush1.bf16.msra.mxu0 %v4075_v38 }
 0x1bb   : > { %v4827_v48 = vpop.f32.mrb[6].mxu0  ;;  %v4829_v49 = vpop.f32.mrb[5].mxu1  ;;  %v1602_v63 = vmul.f32 %v4825_v47, %v4825_v47  ;;  %v2121_v21 = vmul.f32 %v4821_v44, %v4821_v44  ;;  %3798 = vmatpush1.bf16.msra.mxu1 %v4075_v38 }
 0x1bc   : > { %1499 = vadd.xlane.f32.xlu0 %v1482_v43  ;;  %v4831_v50 = vpop.f32.mrb[7].mxu0  ;;  %v4835_v53 = vpop.f32.mrb[6].mxu1  ;;  %v2241_v56 = vmul.f32 %v4829_v49, %v4829_v49  ;;  %v1484_v17 = vmul.f32 %v4827_v48, %v4827_v48 }
 0x1bd   : > { %5822 = vst [vmem:[#allocation26_spill] sm:$0xff] %v4831_v50  ;;  %1618 = vadd.xlane.f32.xlu1 %v1601_v46  ;;  %v4839_v55 = vpop.f32.mrb[7].mxu1  ;;  %v1603_v23 = vmul.f32 %v4835_v53, %v4835_v53  ;;  %v2122_v43 = vmul.f32 %v4831_v50, %v4831_v50  ;;  %v4080_v46 = vld [vmem:[#allocation5 + $0x224] ss:$24 sps:$4 sm:$0xff]  }
 0x1be   : > { %5823 = vst [vmem:[#allocation27_spill] sm:$0xff] %v4839_v55  ;;  %1358 = vmatprep.subr.bf16.mxu0 %v4080_v46  ;;  %3783 = vmatprep.subr.bf16.mxu1 %v4080_v46  ;;  %v4084_v46 = vld [vmem:[#allocation5 + $0x280] ss:$24 sps:$4 sm:$0xff]  }
 0x1bf   : > { %1359 = vmatpush1.bf16.msra.mxu0 %v4078_v51  ;;  %3799 = vmatpush1.bf16.msra.mxu1 %v4078_v51 }
 0x1c0   : > { %2137 = vadd.xlane.f32.xlu0 %v2120_v54  ;;  %1360 = vmatprep.subr.bf16.mxu0 %v4083_v16 }
 0x1c1   : > { %1501 = vadd.xlane.f32.xlu1 %v1483_v52  ;;  %v4843_v57 = vpop.f32.mrb[8].mxu0  ;;  %3784 = vmatprep.subr.bf16.mxu1 %v4083_v16 }
 0x1c2   : > { %v4847_v59 = vpop.f32.mrb[9].mxu0  ;;  %v4849_v60 = vpop.f32.mrb[8].mxu1 }
 0x1c3   : > { %5824 = vst [vmem:[#allocation28_spill] sm:$0xff] %v4847_v59  ;;  %5825 = vst [vmem:[#allocation29_spill] sm:$0xff] %v4849_v60  ;;  %v4851_v61 = vpop.f32.mrb[10].mxu0  ;;  %v4855_v0 = vpop.f32.mrb[9].mxu1  ;;  %v2123_v40 = vmul.f32 %v4847_v59, %v4847_v59  ;;  %1361 = vmatpush1.bf16.msra.mxu0 %v4081_v22  ;;  %3800 = vmatpush1.bf16.msra.mxu1 %v4081_v22 }
 0x1c4   : > { %5826 = vst [vmem:[#allocation30_spill] sm:$0xff] %v4851_v61  ;;  %2257 = vadd.xlane.f32.xlu0 %v2240_v58  ;;  %5827 = vst [vmem:[#allocation31_spill] sm:$0xff] %v4855_v0  ;;  %v4857_v8 = vpop.f32.mrb[11].mxu0  ;;  %v4861_v18 = vpop.f32.mrb[10].mxu1  ;;  %v2243_v52 = vmul.f32 %v4855_v0, %v4855_v0 }
 0x1c5   : > { %5828 = vst [vmem:[#allocation32_spill] sm:$0xff] %v4857_v8  ;;  %2259 = vadd.xlane.f32.xlu1 %v2241_v56  ;;  %5829 = vst [vmem:[#allocation33_spill] sm:$0xff] %v4861_v18  ;;  %v4863_v19 = vpop.f32.mrb[11].mxu1  ;;  %v2242_v56 = vmul.f32 %v4839_v55, %v4839_v55  ;;  %v1605_v51 = vmul.f32 %v4861_v18, %v4861_v18 }
 0x1c6   : > { %5830 = vst [vmem:[#allocation34_spill] sm:$0xff] %v4863_v19 }
 0x1c8   : > { %1620 = vadd.xlane.f32.xlu0 %v1602_v63 }
 0x1c9   : > { %1503 = vadd.xlane.f32.xlu1 %v1484_v17  ;;  %v4869_v24 = vpop.f32.mrb[12].mxu0  ;;  %v1485_v17 = vmul.f32 %v4843_v57, %v4843_v57 }
 0x1ca   : > { %5831 = vst [vmem:[#allocation35_spill] sm:$0xff] %v4869_v24  ;;  %v4871_v25 = vpop.f32.mrb[13].mxu0  ;;  %v4873_v28 = vpop.f32.mrb[12].mxu1 }
 0x1cb   : > { %5832 = vst [vmem:[#allocation36_spill] sm:$0xff] %v4871_v25  ;;  %v4875_v31 = vpop.f32.mrb[14].mxu0  ;;  %v4877_v35 = vpop.f32.mrb[13].mxu1  ;;  %v2125_v18 = vmul.f32 %v4871_v25, %v4871_v25  ;;  %v2244_v25 = vmul.f32 %v4863_v19, %v4863_v19 }
 0x1cc   : > { %5833 = vst [vmem:[#allocation37_spill] sm:$0xff] %v4875_v31  ;;  %2139 = vadd.xlane.f32.xlu0 %v2121_v21  ;;  %5834 = vst [vmem:[#allocation38_spill] sm:$0xff] %v4877_v35  ;;  %v4879_v36 = vpop.f32.mrb[15].mxu0  ;;  %v4883_v41 = vpop.f32.mrb[14].mxu1  ;;  %v1488_v19 = vmul.f32 %v4875_v31, %v4875_v31 }
 0x1cd   : > { %1622 = vadd.xlane.f32.xlu1 %v1603_v23  ;;  %5835 = vst [vmem:[#allocation39_spill] sm:$0xff] %v4883_v41  ;;  %v4887_v45 = vpop.f32.mrb[15].mxu1  ;;  %v1486_v23 = vmul.f32 %v4851_v61, %v4851_v61  ;;  %v4087_v61 = vld [vmem:[#allocation5 + $0x2b0] ss:$24 sps:$4 sm:$0xff]  }
 0x1d0   : > { %2141 = vadd.xlane.f32.xlu0 %v2122_v43  ;;  %v1604_v43 = vmul.f32 %v4849_v60, %v4849_v60 }
 0x1d1   : > { %2143 = vadd.xlane.f32.xlu1 %v2123_v40  ;;  %v4891_v54 = vpop.f32.mrb[16].mxu0  ;;  %v4086_v40 = vld [vmem:[#allocation5 + $0x284] ss:$24 sps:$4 sm:$0xff]  }
 0x1d2   : > { %v4895_v58 = vpop.f32.mrb[17].mxu0  ;;  %v4897_v62 = vpop.f32.mrb[16].mxu1  ;;  %1362 = vmatprep.subr.bf16.mxu0 %v4086_v40  ;;  %3785 = vmatprep.subr.bf16.mxu1 %v4086_v40  ;;  %v2124_v40 = vmul.f32 %v4857_v8, %v4857_v8 }
 0x1d3   : > { %v4899_v63 = vpop.f32.mrb[18].mxu0  ;;  %v4903_v20 = vpop.f32.mrb[17].mxu1  ;;  %1363 = vmatpush1.bf16.msra.mxu0 %v4084_v46  ;;  %3801 = vmatpush1.bf16.msra.mxu1 %v4084_v46  ;;  %v4090_v46 = vld [vmem:[#allocation5 + $0x2e0] ss:$24 sps:$4 sm:$0xff]  }
 0x1d4   : > { %2261 = vadd.xlane.f32.xlu0 %v2242_v56  ;;  %v4905_v21 = vpop.f32.mrb[19].mxu0  ;;  %v4909_v34 = vpop.f32.mrb[18].mxu1 }
 0x1d5   : > { %2263 = vadd.xlane.f32.xlu1 %v2243_v52  ;;  %v4911_v38 = vpop.f32.mrb[19].mxu1 }
 0x1d8   : > { %1505 = vadd.xlane.f32.xlu0 %v1485_v17  ;;  %v4089_v17 = vld [vmem:[#allocation5 + $0x2b4] ss:$24 sps:$4 sm:$0xff]  }
 0x1d9   : > { %1507 = vadd.xlane.f32.xlu1 %v1486_v23  ;;  %v4917_v52 = vpop.f32.mrb[20].mxu0  ;;  %1364 = vmatprep.subr.bf16.mxu0 %v4089_v17 }
 0x1da   : > { %v4919_v56 = vpop.f32.mrb[21].mxu0  ;;  %v4921_v16 = vpop.f32.mrb[20].mxu1  ;;  %3786 = vmatprep.subr.bf16.mxu1 %v4089_v17  ;;  %1365 = vmatpush1.bf16.msra.mxu0 %v4087_v61 }
 0x1db   : > { %v4923_v22 = vpop.f32.mrb[22].mxu0  ;;  %v4925_v0 = vpop.f32.mrb[21].mxu1  ;;  %3802 = vmatpush1.bf16.msra.mxu1 %v4087_v61 }
 0x1dc   : > { %1624 = vadd.xlane.f32.xlu0 %v1604_v43  ;;  %v4927_v23 = vpop.f32.mrb[23].mxu0  ;;  %v4931_v59 = vpop.f32.mrb[22].mxu1  ;;  %v4092_v43 = vld [vmem:[#allocation5 + $0x2e4] ss:$24 sps:$4 sm:$0xff]  }
 0x1dd   : > { %1626 = vadd.xlane.f32.xlu1 %v1605_v51  ;;  %v4935_v55 = vpop.f32.mrb[23].mxu1  ;;  %v2245_v51 = vmul.f32 %v4877_v35, %v4877_v35  ;;  %1366 = vmatprep.subr.bf16.mxu0 %v4092_v43 }
 0x1de   : > { %3787 = vmatprep.subr.bf16.mxu1 %v4092_v43  ;;  %1367 = vmatpush1.bf16.msra.mxu0 %v4090_v46 }
 0x1df   : > { %3803 = vmatpush1.bf16.msra.mxu1 %v4090_v46  ;;  %v1607_v46 = vmul.f32 %v4883_v41, %v4883_v41 }
 0x1e0   : > { %2145 = vadd.xlane.f32.xlu0 %v2124_v40 }
 0x1e1   : > { %2147 = vadd.xlane.f32.xlu1 %v2125_v18  ;;  %v4939_v60 = vpop.f32.mrb[24].mxu0  ;;  %v1487_v18 = vmul.f32 %v4869_v24, %v4869_v24  ;;  %1369 = vmatmul.mubr.bf16.vlgmr.msra.gmra.mrb[32].mxu0 %v4722_v1 }
 0x1e2   : > { %v4943_v50 = vpop.f32.mrb[25].mxu0  ;;  %v4945_v17 = vpop.f32.mrb[24].mxu1  ;;  %1409 = vmatmul.mubr.bf16.vlgmr.msra.gmra.mrb[32].mxu1 %v4758_v9  ;;  %1378 = vmatprep.mubr.bf16.mxu0 %v4725_v2 }
 0x1e3   : > { %v4947_v61 = vpop.f32.mrb[26].mxu0  ;;  %v4951_v40 = vpop.f32.mrb[25].mxu1  ;;  %1418 = vmatprep.mubr.bf16.mxu1 %v4761_v10  ;;  %v2127_v10 = vmul.f32 %v4895_v58, %v4895_v58 }
 0x1e4   : > { %2265 = vadd.xlane.f32.xlu0 %v2244_v25  ;;  %v4953_v35 = vpop.f32.mrb[27].mxu0  ;;  %v4957_v8 = vpop.f32.mrb[26].mxu1  ;;  %v1606_v25 = vmul.f32 %v4873_v28, %v4873_v28 }
 0x1e5   : > { %2267 = vadd.xlane.f32.xlu1 %v2245_v51  ;;  %v4960_v43 = vpop.f32.mrb[27].mxu1 }
 0x1e8   : > { %1509 = vadd.xlane.f32.xlu0 %v1487_v18  ;;  %v2126_v18 = vmul.f32 %v4879_v36, %v4879_v36 }
 0x1e9   : > { %1511 = vadd.xlane.f32.xlu1 %v1488_v19  ;;  %v4969_v51 = vpop.f32.mrb[28].mxu0  ;;  %1379 = vmatmul.mubr.bf16.gmra.mrb[36].mxu0 %v4732_v3  ;;  %v1489_v3 = vmul.f32 %v4891_v54, %v4891_v54 }
 0x1ea   : > { %v4971_v31 = vpop.f32.mrb[29].mxu0  ;;  %v4973_v1 = vpop.f32.mrb[28].mxu1  ;;  %1419 = vmatmul.mubr.bf16.gmra.mrb[36].mxu1 %v4768_v11  ;;  %1388 = vmatprep.mubr.bf16.mxu0 %v4735_v4  ;;  %v1490_v11 = vmul.f32 %v4899_v63, %v4899_v63  ;;  %v1608_v4 = vmul.f32 %v4897_v62, %v4897_v62 }
 0x1eb   : > { %v4975_v24 = vpop.f32.mrb[30].mxu0  ;;  %v4977_v2 = vpop.f32.mrb[29].mxu1  ;;  %1428 = vmatprep.mubr.bf16.mxu1 %v4771_v12  ;;  %v1609_v12 = vmul.f32 %v4909_v34, %v4909_v34 }
 0x1ec   : > { %1628 = vadd.xlane.f32.xlu0 %v1606_v25  ;;  %v4979_v9 = vpop.f32.mrb[31].mxu0  ;;  %v4983_v19 = vpop.f32.mrb[30].mxu1  ;;  %v2247_v25 = vmul.f32 %v4903_v20, %v4903_v20 }
 0x1ed   : > { %5836 = vst [vmem:[#allocation40_spill] sm:$0xff] %v4979_v9  ;;  %1630 = vadd.xlane.f32.xlu1 %v1607_v46  ;;  %5837 = vst [vmem:[#allocation41_spill] sm:$0xff] %v4983_v19  ;;  %v4988_v41 = vpop.f32.mrb[31].mxu1  ;;  %v2246_v46 = vmul.f32 %v4887_v45, %v4887_v45 }
 0x1ee   : > { %5838 = vst [vmem:[#allocation42_spill] sm:$0xff] %v4988_v41 }
 0x1f0   : > { %2149 = vadd.xlane.f32.xlu0 %v2126_v18  ;;  %v1611_v18 = vmul.f32 %v4931_v59, %v4931_v59 }
 0x1f1   : > { %2151 = vadd.xlane.f32.xlu1 %v2127_v10  ;;  %1389 = vmatmul.mubr.bf16.gmra.mrb[40].mxu0 %v4742_v5  ;;  %v2129_v10 = vmul.f32 %v4919_v56, %v4919_v56  ;;  %v2128_v5 = vmul.f32 %v4905_v21, %v4905_v21 }
 0x1f2   : > { %1429 = vmatmul.mubr.bf16.gmra.mrb[40].mxu1 %v4778_v13  ;;  %1398 = vmatprep.mubr.bf16.mxu0 %v4745_v6  ;;  %v2249_v6 = vmul.f32 %v4925_v0, %v4925_v0  ;;  %v2248_v13 = vmul.f32 %v4911_v38, %v4911_v38 }
 0x1f3   : > { %1438 = vmatprep.mubr.bf16.mxu1 %v4781_v14  ;;  %v1491_v14 = vmul.f32 %v4917_v52, %v4917_v52 }
 0x1f4   : > { %2269 = vadd.xlane.f32.xlu0 %v2246_v46  ;;  %v2130_v46 = vmul.f32 %v4927_v23, %v4927_v23 }
 0x1f5   : > { %2271 = vadd.xlane.f32.xlu1 %v2247_v25  ;;  %v2131_v25 = vmul.f32 %v4943_v50, %v4943_v50 }
 0x1f8   : > { %1513 = vadd.xlane.f32.xlu0 %v1489_v3  ;;  %v2251_v3 = vmul.f32 %v4951_v40, %v4951_v40 }
 0x1f9   : > { %1515 = vadd.xlane.f32.xlu1 %v1490_v11  ;;  %1399 = vmatmul.mubr.bf16.gmra.mrb[44].mxu0 %v4752_v7  ;;  %v1492_v7 = vmul.f32 %v4923_v22, %v4923_v22  ;;  %v2250_v11 = vmul.f32 %v4935_v55, %v4935_v55 }
 0x1fa   : > { %1439 = vmatmul.mubr.bf16.gmra.mrb[44].mxu1 %v4788_v15  ;;  %v1610_v15 = vmul.f32 %v4921_v16, %v4921_v16 }
 0x1fc   : > { %1632 = vadd.xlane.f32.xlu0 %v1608_v4  ;;  %v1493_v4 = vmul.f32 %v4939_v60, %v4939_v60 }
 0x1fd   : > { %1634 = vadd.xlane.f32.xlu1 %v1609_v12  ;;  %v1494_v12 = vmul.f32 %v4947_v61, %v4947_v61 }
 0x200   : > { %2153 = vadd.xlane.f32.xlu0 %v2128_v5  ;;  %v1613_v5 = vmul.f32 %v4957_v8, %v4957_v8 }
 0x201   : > { %2155 = vadd.xlane.f32.xlu1 %v2129_v10  ;;  %v1612_v10 = vmul.f32 %v4945_v17, %v4945_v17 }
 0x204   : > { %2273 = vadd.xlane.f32.xlu0 %v2248_v13  ;;  %v2132_v13 = vmul.f32 %v4953_v35, %v4953_v35 }
 0x205   : > { %2275 = vadd.xlane.f32.xlu1 %v2249_v6  ;;  %v2133_v6 = vmul.f32 %v4971_v31, %v4971_v31 }
 0x208   : > { %1517 = vadd.xlane.f32.xlu0 %v1491_v14  ;;  %v2253_v14 = vmul.f32 %v4977_v2, %v4977_v2 }
 0x209   : > { %1519 = vadd.xlane.f32.xlu1 %v1492_v7  ;;  %v2252_v7 = vmul.f32 %v4960_v43, %v4960_v43 }
 0x20c   : > { %1636 = vadd.xlane.f32.xlu0 %v1610_v15  ;;  %v1495_v15 = vmul.f32 %v4969_v51, %v4969_v51 }
 0x20d   : > { %1638 = vadd.xlane.f32.xlu1 %v1611_v18  ;;  %v1496_v18 = vmul.f32 %v4975_v24, %v4975_v24 }
 0x210   : > { %2157 = vadd.xlane.f32.xlu0 %v2130_v46  ;;  %v1615_v46 = vmul.f32 %v4983_v19, %v4983_v19 }
 0x211   : > { %2159 = vadd.xlane.f32.xlu1 %v2131_v25  ;;  %v1614_v25 = vmul.f32 %v4973_v1, %v4973_v1 }
 0x214   : > { %2277 = vadd.xlane.f32.xlu0 %v2250_v11  ;;  %v2254_v11 = vmul.f32 %v4988_v41, %v4988_v41 }
 0x215   : > { %2279 = vadd.xlane.f32.xlu1 %v2251_v3  ;;  %v2134_v3 = vmul.f32 %v4979_v9, %v4979_v9 }
 0x218   : > { %1521 = vadd.xlane.f32.xlu0 %v1493_v4 }
 0x219   : > { %1523 = vadd.xlane.f32.xlu1 %v1494_v12 }
 0x21c   : > { %1640 = vadd.xlane.f32.xlu0 %v1612_v10 }
 0x21d   : > { %1642 = vadd.xlane.f32.xlu1 %v1613_v5 }
 0x220   : > { %2161 = vadd.xlane.f32.xlu0 %v2132_v13 }
 0x221   : > { %2163 = vadd.xlane.f32.xlu1 %v2133_v6 }
 0x224   : > { %2281 = vadd.xlane.f32.xlu0 %v2252_v7 }
 0x225   : > { %2283 = vadd.xlane.f32.xlu1 %v2253_v14 }
 0x228   : > { %1525 = vadd.xlane.f32.xlu0 %v1495_v15 }
 0x229   : > { %1527 = vadd.xlane.f32.xlu1 %v1496_v18 }
 0x22c   : > { %1644 = vadd.xlane.f32.xlu0 %v1614_v25 }
 0x22d   : > { %1646 = vadd.xlane.f32.xlu1 %v1615_v46 }
 0x230   : > { %2165 = vadd.xlane.f32.xlu0 %v2134_v3 }
 0x234   : > { %2285 = vadd.xlane.f32.xlu0 %v2254_v11 }
 0x241   : > { %v1498_v4 = vpop.xlane.xlu0 %1497 }
 0x242   : > { %v1529_v12 = vmax.f32 %v1498_v4, 1e-24  ;;  %v2136_v10 = vpop.xlane.xlu1 %2135 }
 0x243   : > { %v2167_v5 = vmax.f32 %v2136_v10, 1e-24 }
 0x244   : > { %4093 = vrsqrt.f32 %v1529_v12  ;;  %v5066_v12 = vld [vmem:[%s5737_s2] ss:$0 sm:$0xff] }
 0x245   : > { %v1617_v6 = vpop.xlane.xlu0 %1616  ;;  %4095 = vrsqrt.f32 %v2167_v5 }
 0x246   : > { %v1648_v13 = vmax.f32 %v1617_v6, 1e-24  ;;  %v2256_v14 = vpop.xlane.xlu1 %2255 }
 0x247   : > { %v2287_v7 = vmax.f32 %v2256_v14, 1e-24 }
 0x248   : > { %4097 = vrsqrt.f32 %v1648_v13 }
 0x249   : > { %v1500_v15 = vpop.xlane.xlu0 %1499  ;;  %4099 = vrsqrt.f32 %v2287_v7 }
 0x24a   : > { %v1530_v18 = vmax.f32 %v1500_v15, 1e-24  ;;  %v1619_v25 = vpop.xlane.xlu1 %1618 }
 0x24b   : > { %v1649_v46 = vmax.f32 %v1619_v25, 1e-24  ;;  %v5075_v25 = vld [vmem:[%s5738_s3] ss:$0 sm:$0xff] }
 0x24c   : > { %4101 = vrsqrt.f32 %v1530_v18 }
 0x24d   : > { %4103 = vrsqrt.f32 %v1649_v46  ;;  %v2138_v3 = vpop.xlane.xlu0 %2137 }
 0x24e   : > { %v4094_v11 = vpop.eup %4093  ;;  %v2168_v41 = vmax.f32 %v2138_v3, 1e-24  ;;  %v1502_v4 = vpop.xlane.xlu1 %1501 }
 0x24f   : > { %v1561_v10 = vmul.f32 %v4094_v11, %v4793_v26  ;;  %v4096_v5 = vpop.eup %4095  ;;  %v1531_v7 = vmax.f32 %v1502_v4, 1e-24 }
 0x250   : > { %4105 = vrsqrt.f32 %v2168_v41  ;;  %v2199_v4 = vmul.f32 %v4096_v5, %v4795_v27 }
 0x251   : > { %v2258_v6 = vpop.xlane.xlu0 %2257  ;;  %v5070_v13 = vmul.f32 %v5066_v12, %v1561_v10 }
 0x252   : > { %v4098_v14 = vpop.eup %4097  ;;  %v2288_v15 = vmax.f32 %v2258_v6, 1e-24  ;;  %v2260_v18 = vpop.xlane.xlu1 %2259 }
 0x253   : > { %v2289_v46 = vmax.f32 %v2260_v18, 1e-24  ;;  %1735 = vrot.lane.b32.xlu0 %v5070_v13, %s4399_s22  ;;  %v1680_v26 = vmul.f32 %v4098_v14, %v4799_v29  ;;  %v4100_v41 = vpop.eup %4099  ;;  %v5087_v18 = vld [vmem:[%s5737_s2 + $0x1] ss:$0 sm:$0xff] }
 0x254   : > { %4107 = vrsqrt.f32 %v2288_v15  ;;  %v5096_v5 = vmul.f32 %v5087_v18, %v2199_v4  ;;  %v2319_v15 = vmul.f32 %v4100_v41, %v4805_v32 }
 0x255   : > { %v1621_v3 = vpop.xlane.xlu0 %1620  ;;  %v5081_v11 = vmul.f32 %v5075_v25, %v1680_v26  ;;  %4109 = vrsqrt.f32 %v1531_v7 }
 0x256   : > { %v4102_v10 = vpop.eup %4101  ;;  %v1650_v6 = vmax.f32 %v1621_v3, 1e-24  ;;  %v1504_v9 = vpop.xlane.xlu1 %1503  ;;  %4111 = vrsqrt.f32 %v2289_v46  ;;  %5841 = vst [vmem:[#allocation45_spill] sm:$0xff] %v5096_v5 }
 0x257   : > { %5839 = vst [vmem:[#allocation43_spill] sm:$0xff] %v5081_v11  ;;  %v4104_v19 = vpop.eup %4103  ;;  %1815 = vrot.lane.b32.xlu0 %v5081_v11, %s4399_s22  ;;  %v1562_v29 = vmul.f32 %v4102_v10, %v4801_v30  ;;  %v5103_v11 = vld [vmem:[%s5738_s3 + $0x1] ss:$0 sm:$0xff]  ;;  %v1532_v30 = vmax.f32 %v1504_v9, 1e-24 }
 0x258   : > { %4113 = vrsqrt.f32 %v1650_v6  ;;  %v1681_v7 = vmul.f32 %v4104_v19, %v4811_v37  ;;  %v5113_v32 = vmul.f32 %v5103_v11, %v2319_v15 }
 0x259   : > { %v2140_v14 = vpop.xlane.xlu0 %2139  ;;  %v5093_v27 = vmul.f32 %v5066_v12, %v1562_v29 }
 0x25a   : > { %v4106_v26 = vpop.eup %4105  ;;  %v2169_v3 = vmax.f32 %v2140_v14, 1e-24  ;;  %v1623_v46 = vpop.xlane.xlu1 %1622  ;;  %v5110_v37 = vmul.f32 %v5075_v25, %v1681_v7  ;;  %5843 = vst [vmem:[#allocation47_spill] sm:$0xff] %v5113_v32 }
 0x25b   : > { %5840 = vst [vmem:[#allocation44_spill] sm:$0xff] %v5093_v27  ;;  %1737 = vrot.lane.b32.xlu1 %v5093_v27, %s4399_s22  ;;  %2375 = vrot.lane.b32.xlu0 %v5096_v5, %s4399_s22  ;;  %v2200_v19 = vmul.f32 %v4106_v26, %v4807_v33  ;;  %v1651_v9 = vmax.f32 %v1623_v46, 1e-24 }
 0x25c   : > { %4115 = vrsqrt.f32 %v2169_v3  ;;  %5842 = vst [vmem:[#allocation46_spill] sm:$0xff] %v5110_v37 }
 0x25d   : > { %v2142_v4 = vpop.xlane.xlu0 %2141  ;;  %4117 = vrsqrt.f32 %v1532_v30  ;;  %v5121_v7 = vmul.f32 %v5087_v18, %v2200_v19 }
 0x25e   : > { %v4108_v41 = vpop.eup %4107  ;;  %v2144_v10 = vpop.xlane.xlu1 %2143  ;;  %v2170_v26 = vmax.f32 %v2142_v4, 1e-24  ;;  %4119 = vrsqrt.f32 %v1651_v9 }
 0x25f   : > { %1817 = vrot.lane.b32.xlu1 %v5110_v37, %s4399_s22  ;;  %2455 = vrot.lane.b32.xlu0 %v5113_v32, %s4399_s22  ;;  %v4110_v6 = vpop.eup %4109  ;;  %5844 = vst [vmem:[#allocation48_spill] sm:$0xff] %v5121_v7  ;;  %v2320_v15 = vmul.f32 %v4108_v41, %v4815_v39  ;;  %v2171_v37 = vmax.f32 %v2144_v10, 1e-24 }
 0x260   : > { %v4112_v29 = vpop.eup %4111  ;;  %v1563_v19 = vmul.f32 %v4110_v6, %v4817_v42  ;;  %4121 = vrsqrt.f32 %v2170_v26 }
 0x261   : > { %v2262_v14 = vpop.xlane.xlu0 %2261  ;;  %v5128_v30 = vmul.f32 %v5103_v11, %v2320_v15  ;;  %v2321_v39 = vmul.f32 %v4112_v29, %v4829_v49 }
 0x262   : > { %v4114_v3 = vpop.eup %4113  ;;  %v2264_v33 = vpop.xlane.xlu1 %2263 }
 0x263   : > { %2377 = vrot.lane.b32.xlu1 %v5121_v7, %s4399_s22  ;;  %v1682_v5 = vmul.f32 %v4114_v3, %v4825_v47  ;;  %v2290_v7 = vmax.f32 %v2262_v14, 1e-24  ;;  %v5143_v42 = vmul.f32 %v5103_v11, %v2321_v39  ;;  %v2291_v9 = vmax.f32 %v2264_v33, 1e-24 }
 0x265   : > { %v1506_v32 = vpop.xlane.xlu0 %1505  ;;  %v5131_v46 = vmul.f32 %v5075_v25, %v1682_v5  ;;  %v5140_v5 = vmul.f32 %v5066_v12, %v1563_v19  ;;  %5845 = vst [vmem:[#allocation49_spill] sm:$0xff] %v5143_v42 }
 0x266   : > { %v4116_v41 = vpop.eup %4115  ;;  %v1533_v4 = vmax.f32 %v1506_v32, 1e-24  ;;  %v1508_v27 = vpop.xlane.xlu1 %1507 }
 0x267   : > { %2457 = vrot.lane.b32.xlu1 %v5128_v30, %s4399_s22  ;;  %1819 = vrot.lane.b32.xlu0 %v5131_v46, %s4399_s22  ;;  %v2201_v49 = vmul.f32 %v4116_v41, %v4821_v44  ;;  %v4118_v32 = vpop.eup %4117  ;;  %v1534_v29 = vmax.f32 %v1508_v27, 1e-24 }
 0x268   : > { %4123 = vrsqrt.f32 %v1533_v4  ;;  %v1564_v44 = vmul.f32 %v4118_v32, %v4827_v48  ;;  %v4120_v3 = vpop.eup %4119 }
 0x269   : > { %v1625_v47 = vpop.xlane.xlu0 %1624  ;;  %4125 = vrsqrt.f32 %v2171_v37  ;;  %v5151_v15 = vmul.f32 %v5087_v18, %v2201_v49  ;;  %v1683_v27 = vmul.f32 %v4120_v3, %v4835_v53 }
 0x26a   : > { %v1652_v10 = vmax.f32 %v1625_v47, 1e-24  ;;  %v1627_v6 = vpop.xlane.xlu1 %1626  ;;  %4127 = vrsqrt.f32 %v2290_v7  ;;  %v4122_v33 = vpop.eup %4121  ;;  %v5157_v19 = vmul.f32 %v5066_v12, %v1564_v44 }
 0x26b   : > { %1739 = vrot.lane.b32.xlu1 %v5140_v5, %s4399_s22  ;;  %2459 = vrot.lane.b32.xlu0 %v5143_v42, %s4399_s22  ;;  %5846 = vst [vmem:[#allocation50_spill] sm:$0xff] %v5151_v15  ;;  %v1653_v7 = vmax.f32 %v1627_v6, 1e-24 }
 0x26c   : > { %4129 = vrsqrt.f32 %v1652_v10  ;;  %v5164_v10 = vmul.f32 %v5075_v25, %v1683_v27 }
 0x26d   : > { %v2146_v14 = vpop.xlane.xlu0 %2145  ;;  %4131 = vrsqrt.f32 %v2291_v9  ;;  %v5849_v9 = vld [vmem:[#allocation26_spill] sm:$0xff] }
 0x26e   : > { %v2148_v37 = vpop.xlane.xlu1 %2147  ;;  %4133 = vrsqrt.f32 %v1534_v29  ;;  %v2172_v4 = vmax.f32 %v2146_v14, 1e-24  ;;  %5847 = vst [vmem:[#allocation51_spill] sm:$0xff] %v5164_v10  ;;  %v2202_v53 = vmul.f32 %v4122_v33, %v5849_v9  ;;  %v5852_v33 = vld [vmem:[#allocation27_spill] sm:$0xff] }
 0x26f   : > { %2379 = vrot.lane.b32.xlu1 %v5151_v15, %s4399_s22  ;;  %4135 = vrsqrt.f32 %v1653_v7  ;;  %v2173_v44 = vmax.f32 %v2148_v37, 1e-24 }
 0x270   : > { %4137 = vrsqrt.f32 %v2172_v4 }
 0x271   : > { %v2266_v26 = vpop.xlane.xlu0 %2265 }
 0x272   : > { %v4124_v39 = vpop.eup %4123  ;;  %v2268_v41 = vpop.xlane.xlu1 %2267  ;;  %v2292_v42 = vmax.f32 %v2266_v26, 1e-24  ;;  %v5853_v26 = vld [vmem:[#allocation28_spill] sm:$0xff] }
 0x273   : > { %1741 = vrot.lane.b32.xlu1 %v5157_v19, %s4399_s22  ;;  %v1565_v48 = vmul.f32 %v4124_v39, %v4843_v57  ;;  %v4126_v47 = vpop.eup %4125  ;;  %v5850_v57 = vld [vmem:[#allocation29_spill] sm:$0xff] }
 0x274   : > { %v4128_v49 = vpop.eup %4127 }
 0x275   : > { %v1510_v32 = vpop.xlane.xlu0 %1509  ;;  %v5167_v6 = vmul.f32 %v5066_v12, %v1565_v48  ;;  %v5176_v48 = vmul.f32 %v5087_v18, %v2202_v53  ;;  %v2322_v4 = vmul.f32 %v4128_v49, %v5852_v33  ;;  %v5856_v49 = vld [vmem:[#allocation30_spill] sm:$0xff] }
 0x276   : > { %v4130_v29 = vpop.eup %4129  ;;  %v1535_v14 = vmax.f32 %v1510_v32, 1e-24  ;;  %v1512_v3 = vpop.xlane.xlu1 %1511  ;;  %v2203_v32 = vmul.f32 %v4126_v47, %v5853_v26 }
 0x277   : > { %5848 = vst [vmem:[#allocation52_spill] sm:$0xff] %v5167_v6  ;;  %1821 = vrot.lane.b32.xlu1 %v5164_v10, %s4399_s22  ;;  %1743 = vrot.lane.b32.xlu0 %v5167_v6, %s4399_s22  ;;  %v1684_v7 = vmul.f32 %v4130_v29, %v5850_v57  ;;  %v4132_v27 = vpop.eup %4131  ;;  %v2293_v6 = vmax.f32 %v2268_v41, 1e-24  ;;  %v1536_v53 = vmax.f32 %v1512_v3, 1e-24  ;;  %v5857_v57 = vld [vmem:[#allocation31_spill] sm:$0xff] }
 0x278   : > { %4139 = vrsqrt.f32 %v1535_v14  ;;  %v4134_v9 = vpop.eup %4133  ;;  %v5188_v14 = vmul.f32 %v5103_v11, %v2322_v4  ;;  %v5191_v47 = vmul.f32 %v5087_v18, %v2203_v32 }
 0x279   : > { %v1629_v39 = vpop.xlane.xlu0 %1628  ;;  %v5179_v37 = vmul.f32 %v5075_v25, %v1684_v7  ;;  %4141 = vrsqrt.f32 %v2173_v44  ;;  %v1566_v44 = vmul.f32 %v4134_v9, %v5856_v49  ;;  %v4136_v41 = vpop.eup %4135 }
 0x27a   : > { %v1654_v15 = vmax.f32 %v1629_v39, 1e-24  ;;  %v1631_v10 = vpop.xlane.xlu1 %1630  ;;  %4143 = vrsqrt.f32 %v2292_v42  ;;  %5854 = vst [vmem:[#allocation29_spill] sm:$0xff] %v5188_v14  ;;  %5855 = vst [vmem:[#allocation27_spill] sm:$0xff] %v5191_v47  ;;  %v2323_v42 = vmul.f32 %v4132_v27, %v5857_v57  ;;  %v4138_v3 = vpop.eup %4137  ;;  %v5860_v27 = vld [vmem:[#allocation33_spill] sm:$0xff] }
 0x27b   : > { %5851 = vst [vmem:[#allocation26_spill] sm:$0xff] %v5179_v37  ;;  %2381 = vrot.lane.b32.xlu1 %v5176_v48, %s4399_s22  ;;  %1823 = vrot.lane.b32.xlu0 %v5179_v37, %s4399_s22  ;;  %v5200_v33 = vmul.f32 %v5066_v12, %v1566_v44  ;;  %v1685_v26 = vmul.f32 %v4136_v41, %v5860_v27  ;;  %v5864_v27 = vld [vmem:[#allocation32_spill] sm:$0xff] }
 0x27c   : > { %4145 = vrsqrt.f32 %v1654_v15  ;;  %v1655_v15 = vmax.f32 %v1631_v10, 1e-24  ;;  %v5203_v4 = vmul.f32 %v5103_v11, %v2323_v42  ;;  %v5861_v10 = vld [vmem:[#allocation35_spill] sm:$0xff] }
 0x27d   : > { %v2150_v29 = vpop.xlane.xlu0 %2149  ;;  %4147 = vrsqrt.f32 %v2293_v6  ;;  %5858 = vst [vmem:[#allocation28_spill] sm:$0xff] %v5200_v33  ;;  %v5212_v42 = vmul.f32 %v5075_v25, %v1685_v26 }
 0x27e   : > { %v2152_v7 = vpop.xlane.xlu1 %2151  ;;  %4149 = vrsqrt.f32 %v1536_v53  ;;  %5859 = vst [vmem:[#allocation30_spill] sm:$0xff] %v5203_v4  ;;  %v2174_v9 = vmax.f32 %v2150_v29, 1e-24  ;;  %v2204_v29 = vmul.f32 %v4138_v3, %v5864_v27  ;;  %v5866_v3 = vld [vmem:[#allocation34_spill] sm:$0xff] }
 0x27f   : > { %2461 = vrot.lane.b32.xlu1 %v5188_v14, %s4399_s22  ;;  %2383 = vrot.lane.b32.xlu0 %v5191_v47, %s4399_s22  ;;  %4151 = vrsqrt.f32 %v1655_v15  ;;  %5862 = vst [vmem:[#allocation31_spill] sm:$0xff] %v5212_v42  ;;  %v2175_v37 = vmax.f32 %v2152_v7, 1e-24 }
 0x280   : > { %4153 = vrsqrt.f32 %v2174_v9 }
 0x281   : > { %v2270_v39 = vpop.xlane.xlu0 %2269 }
 0x282   : > { %v4140_v32 = vpop.eup %4139  ;;  %v2272_v6 = vpop.xlane.xlu1 %2271 }
 0x283   : > { %1745 = vrot.lane.b32.xlu1 %v5200_v33, %s4399_s22  ;;  %2463 = vrot.lane.b32.xlu0 %v5203_v4, %s4399_s22  ;;  %v1567_v53 = vmul.f32 %v4140_v32, %v5861_v10  ;;  %v4142_v49 = vpop.eup %4141  ;;  %v2294_v4 = vmax.f32 %v2270_v39, 1e-24  ;;  %v5224_v10 = vmul.f32 %v5087_v18, %v2204_v29  ;;  %v5867_v39 = vld [vmem:[#allocation36_spill] sm:$0xff]  ;;  %v5870_v29 = vld [vmem:[#allocation38_spill] sm:$0xff] }
 0x284   : > { %v4144_v44 = vpop.eup %4143 }
 0x285   : > { %v1514_v57 = vpop.xlane.xlu0 %1513  ;;  %v5215_v41 = vmul.f32 %v5066_v12, %v1567_v53  ;;  %v2324_v9 = vmul.f32 %v4144_v44, %v5866_v3  ;;  %v2205_v53 = vmul.f32 %v4142_v49, %v5867_v39 }
 0x286   : > { %v4146_v47 = vpop.eup %4145  ;;  %v1537_v33 = vmax.f32 %v1514_v57, 1e-24  ;;  %v1516_v14 = vpop.xlane.xlu1 %1515 }
 0x287   : > { %5863 = vst [vmem:[#allocation33_spill] sm:$0xff] %v5215_v41  ;;  %1825 = vrot.lane.b32.xlu1 %v5212_v42, %s4399_s22  ;;  %1747 = vrot.lane.b32.xlu0 %v5215_v41, %s4399_s22  ;;  %v1686_v15 = vmul.f32 %v4146_v47, %v4873_v28  ;;  %v4148_v26 = vpop.eup %4147  ;;  %v2295_v41 = vmax.f32 %v2272_v6, 1e-24  ;;  %v1538_v28 = vmax.f32 %v1516_v14, 1e-24  ;;  %v5239_v49 = vmul.f32 %v5087_v18, %v2205_v53 }
 0x288   : > { %4155 = vrsqrt.f32 %v1537_v33  ;;  %v4150_v57 = vpop.eup %4149  ;;  %v5236_v33 = vmul.f32 %v5103_v11, %v2324_v9 }
 0x289   : > { %v1633_v32 = vpop.xlane.xlu0 %1632  ;;  %v5227_v7 = vmul.f32 %v5075_v25, %v1686_v15  ;;  %4157 = vrsqrt.f32 %v2175_v37  ;;  %5868 = vst [vmem:[#allocation32_spill] sm:$0xff] %v5239_v49  ;;  %v5869_v37 = vld [vmem:[#allocation37_spill] sm:$0xff]  ;;  %v4152_v6 = vpop.eup %4151 }
 0x28a   : > { %v1656_v27 = vmax.f32 %v1633_v32, 1e-24  ;;  %v1635_v42 = vpop.xlane.xlu1 %1634  ;;  %4159 = vrsqrt.f32 %v2294_v4  ;;  %v1568_v44 = vmul.f32 %v4150_v57, %v5869_v37  ;;  %v2325_v4 = vmul.f32 %v4148_v26, %v5870_v29  ;;  %v4154_v32 = vpop.eup %4153  ;;  %v5872_v26 = vld [vmem:[#allocation39_spill] sm:$0xff] }
 0x28b   : > { %5865 = vst [vmem:[#allocation35_spill] sm:$0xff] %v5227_v7  ;;  %2385 = vrot.lane.b32.xlu1 %v5224_v10, %s4399_s22  ;;  %1827 = vrot.lane.b32.xlu0 %v5227_v7, %s4399_s22  ;;  %v1657_v14 = vmax.f32 %v1635_v42, 1e-24  ;;  %v1687_v53 = vmul.f32 %v4152_v6, %v5872_v26 }
 0x28c   : > { %4161 = vrsqrt.f32 %v1656_v27  ;;  %v5248_v9 = vmul.f32 %v5066_v12, %v1568_v44  ;;  %v5251_v39 = vmul.f32 %v5103_v11, %v2325_v4 }
 0x28d   : > { %v2154_v47 = vpop.xlane.xlu0 %2153  ;;  %4163 = vrsqrt.f32 %v2295_v41  ;;  %v5260_v29 = vmul.f32 %v5075_v25, %v1687_v53 }
 0x28e   : > { %v2156_v15 = vpop.xlane.xlu1 %2155  ;;  %4165 = vrsqrt.f32 %v1538_v28  ;;  %5871 = vst [vmem:[#allocation34_spill] sm:$0xff] %v5251_v39  ;;  %v2176_v27 = vmax.f32 %v2154_v47, 1e-24  ;;  %v2206_v47 = vmul.f32 %v4154_v32, %v4879_v36 }
 0x28f   : > { %2465 = vrot.lane.b32.xlu1 %v5236_v33, %s4399_s22  ;;  %2387 = vrot.lane.b32.xlu0 %v5239_v49, %s4399_s22  ;;  %4167 = vrsqrt.f32 %v1657_v14  ;;  %v2177_v26 = vmax.f32 %v2156_v15, 1e-24 }
 0x290   : > { %4169 = vrsqrt.f32 %v2176_v27 }
 0x291   : > { %v2274_v3 = vpop.xlane.xlu0 %2273 }
 0x292   : > { %v4156_v57 = vpop.eup %4155  ;;  %v2276_v41 = vpop.xlane.xlu1 %2275 }
 0x293   : > { %1749 = vrot.lane.b32.xlu1 %v5248_v9, %s4399_s22  ;;  %2467 = vrot.lane.b32.xlu0 %v5251_v39, %s4399_s22  ;;  %v1569_v42 = vmul.f32 %v4156_v57, %v4891_v54  ;;  %v4158_v28 = vpop.eup %4157  ;;  %v2296_v39 = vmax.f32 %v2274_v3, 1e-24  ;;  %v5272_v57 = vmul.f32 %v5087_v18, %v2206_v47 }
 0x294   : > { %v4160_v37 = vpop.eup %4159  ;;  %v2207_v32 = vmul.f32 %v4158_v28, %v4895_v58 }
 0x295   : > { %v1518_v44 = vpop.xlane.xlu0 %1517  ;;  %v5263_v4 = vmul.f32 %v5066_v12, %v1569_v42  ;;  %v2326_v15 = vmul.f32 %v4160_v37, %v4887_v45 }
 0x296   : > { %v4162_v6 = vpop.eup %4161  ;;  %v1539_v49 = vmax.f32 %v1518_v44, 1e-24  ;;  %v1520_v7 = vpop.xlane.xlu1 %1519  ;;  %v2297_v44 = vmax.f32 %v2276_v41, 1e-24  ;;  %v5287_v45 = vmul.f32 %v5087_v18, %v2207_v32 }
 0x297   : > { %1829 = vrot.lane.b32.xlu1 %v5260_v29, %s4399_s22  ;;  %1751 = vrot.lane.b32.xlu0 %v5263_v4, %s4399_s22  ;;  %v1688_v54 = vmul.f32 %v4162_v6, %v4897_v62  ;;  %v4164_v14 = vpop.eup %4163  ;;  %v1540_v62 = vmax.f32 %v1520_v7, 1e-24  ;;  %v5284_v47 = vmul.f32 %v5103_v11, %v2326_v15 }
 0x298   : > { %4171 = vrsqrt.f32 %v1539_v49  ;;  %v4166_v3 = vpop.eup %4165 }
 0x299   : > { %v1637_v53 = vpop.xlane.xlu0 %1636  ;;  %v5275_v36 = vmul.f32 %v5075_v25, %v1688_v54  ;;  %4173 = vrsqrt.f32 %v2177_v26  ;;  %v1570_v58 = vmul.f32 %v4166_v3, %v4899_v63  ;;  %v4168_v41 = vpop.eup %4167 }
 0x29a   : > { %v1658_v27 = vmax.f32 %v1637_v53, 1e-24  ;;  %v1639_v42 = vpop.xlane.xlu1 %1638  ;;  %4175 = vrsqrt.f32 %v2296_v39  ;;  %v2327_v39 = vmul.f32 %v4164_v14, %v4903_v20  ;;  %v4170_v37 = vpop.eup %4169  ;;  %v1689_v20 = vmul.f32 %v4168_v41, %v4909_v34 }
 0x29b   : > { %2389 = vrot.lane.b32.xlu1 %v5272_v57, %s4399_s22  ;;  %1831 = vrot.lane.b32.xlu0 %v5275_v36, %s4399_s22  ;;  %v1659_v7 = vmax.f32 %v1639_v42, 1e-24  ;;  %v5296_v26 = vmul.f32 %v5066_v12, %v1570_v58 }
 0x29c   : > { %4177 = vrsqrt.f32 %v1658_v27  ;;  %v5299_v63 = vmul.f32 %v5103_v11, %v2327_v39  ;;  %v5308_v42 = vmul.f32 %v5075_v25, %v1689_v20 }
 0x29d   : > { %v2158_v49 = vpop.xlane.xlu0 %2157  ;;  %4179 = vrsqrt.f32 %v2297_v44  ;;  %v2208_v44 = vmul.f32 %v4170_v37, %v4905_v21 }
 0x29e   : > { %v2160_v28 = vpop.xlane.xlu1 %2159  ;;  %4181 = vrsqrt.f32 %v1540_v62  ;;  %v2178_v53 = vmax.f32 %v2158_v49, 1e-24 }
 0x29f   : > { %2469 = vrot.lane.b32.xlu1 %v5284_v47, %s4399_s22  ;;  %2391 = vrot.lane.b32.xlu0 %v5287_v45, %s4399_s22  ;;  %4183 = vrsqrt.f32 %v1659_v7  ;;  %v2179_v49 = vmax.f32 %v2160_v28, 1e-24 }
 0x2a0   : > { %4185 = vrsqrt.f32 %v2178_v53 }
 0x2a1   : > { %v2278_v6 = vpop.xlane.xlu0 %2277 }
 0x2a2   : > { %v4172_v54 = vpop.eup %4171  ;;  %v2280_v14 = vpop.xlane.xlu1 %2279  ;;  %v2298_v41 = vmax.f32 %v2278_v6, 1e-24 }
 0x2a3   : > { %1753 = vrot.lane.b32.xlu1 %v5296_v26, %s4399_s22  ;;  %2471 = vrot.lane.b32.xlu0 %v5299_v63, %s4399_s22  ;;  %v1571_v15 = vmul.f32 %v4172_v54, %v4917_v52  ;;  %v4174_v32 = vpop.eup %4173  ;;  %v5320_v54 = vmul.f32 %v5087_v18, %v2208_v44 }
 0x2a4   : > { %v4176_v3 = vpop.eup %4175  ;;  %v2209_v37 = vmul.f32 %v4174_v32, %v4919_v56 }
 0x2a5   : > { %v1522_v27 = vpop.xlane.xlu0 %1521  ;;  %v5311_v34 = vmul.f32 %v5066_v12, %v1571_v15  ;;  %v2328_v28 = vmul.f32 %v4176_v3, %v4911_v38 }
 0x2a6   : > { %v4178_v62 = vpop.eup %4177  ;;  %v1541_v58 = vmax.f32 %v1522_v27, 1e-24  ;;  %v1524_v39 = vpop.xlane.xlu1 %1523  ;;  %v2299_v27 = vmax.f32 %v2280_v14, 1e-24  ;;  %v5335_v38 = vmul.f32 %v5087_v18, %v2209_v37 }
 0x2a7   : > { %1833 = vrot.lane.b32.xlu1 %v5308_v42, %s4399_s22  ;;  %1755 = vrot.lane.b32.xlu0 %v5311_v34, %s4399_s22  ;;  %v1690_v52 = vmul.f32 %v4178_v62, %v4921_v16  ;;  %v4180_v7 = vpop.eup %4179  ;;  %v1542_v16 = vmax.f32 %v1524_v39, 1e-24  ;;  %v5332_v62 = vmul.f32 %v5103_v11, %v2328_v28 }
 0x2a8   : > { %4187 = vrsqrt.f32 %v1541_v58  ;;  %v4182_v6 = vpop.eup %4181  ;;  %v2329_v32 = vmul.f32 %v4180_v7, %v4925_v0 }
 0x2a9   : > { %v1641_v20 = vpop.xlane.xlu0 %1640  ;;  %v5323_v21 = vmul.f32 %v5075_v25, %v1690_v52  ;;  %4189 = vrsqrt.f32 %v2179_v49  ;;  %v1572_v56 = vmul.f32 %v4182_v6, %v4923_v22  ;;  %v4184_v14 = vpop.eup %4183 }
 0x2aa   : > { %v1660_v53 = vmax.f32 %v1641_v20, 1e-24  ;;  %v1643_v15 = vpop.xlane.xlu1 %1642  ;;  %4191 = vrsqrt.f32 %v2298_v41  ;;  %v4186_v58 = vpop.eup %4185  ;;  %v5347_v22 = vmul.f32 %v5103_v11, %v2329_v32  ;;  %v1691_v0 = vmul.f32 %v4184_v14, %v4931_v59 }
 0x2ab   : > { %2393 = vrot.lane.b32.xlu1 %v5320_v54, %s4399_s22  ;;  %1835 = vrot.lane.b32.xlu0 %v5323_v21, %s4399_s22  ;;  %v1661_v3 = vmax.f32 %v1643_v15, 1e-24  ;;  %v5344_v41 = vmul.f32 %v5066_v12, %v1572_v56 }
 0x2ac   : > { %4193 = vrsqrt.f32 %v1660_v53  ;;  %5873 = vst [vmem:[#allocation36_spill] sm:$0xff] %v5347_v22  ;;  %v5356_v15 = vmul.f32 %v5075_v25, %v1691_v0 }
 0x2ad   : > { %v2162_v44 = vpop.xlane.xlu0 %2161  ;;  %4195 = vrsqrt.f32 %v2299_v27  ;;  %v2210_v27 = vmul.f32 %v4186_v58, %v4927_v23 }
 0x2ae   : > { %v2164_v49 = vpop.xlane.xlu1 %2163  ;;  %4197 = vrsqrt.f32 %v1542_v16  ;;  %v2180_v20 = vmax.f32 %v2162_v44, 1e-24 }
 0x2af   : > { %2473 = vrot.lane.b32.xlu1 %v5332_v62, %s4399_s22  ;;  %2395 = vrot.lane.b32.xlu0 %v5335_v38, %s4399_s22  ;;  %4199 = vrsqrt.f32 %v1661_v3  ;;  %v2181_v44 = vmax.f32 %v2164_v49, 1e-24  ;;  %v5369_v49 = vmul.f32 %v5087_v18, %v2210_v27 }
 0x2b0   : > { %4201 = vrsqrt.f32 %v2180_v20 }
 0x2b1   : > { %v2282_v39 = vpop.xlane.xlu0 %2281  ;;  %5875 = vst [vmem:[#allocation38_spill] sm:$0xff] %v5369_v49 }
 0x2b2   : > { %v4188_v52 = vpop.eup %4187  ;;  %v2284_v7 = vpop.xlane.xlu1 %2283  ;;  %v2300_v14 = vmax.f32 %v2282_v39, 1e-24 }
 0x2b3   : > { %1757 = vrot.lane.b32.xlu1 %v5344_v41, %s4399_s22  ;;  %2475 = vrot.lane.b32.xlu0 %v5347_v22, %s4399_s22  ;;  %v1573_v28 = vmul.f32 %v4188_v52, %v4939_v60  ;;  %v4190_v37 = vpop.eup %4189 }
 0x2b4   : > { %v4192_v6 = vpop.eup %4191  ;;  %v2211_v3 = vmul.f32 %v4190_v37, %v4943_v50  ;;  %v1370_v0 = vpop.f32.mrb[32].mxu0 }
 0x2b5   : > { %v1526_v53 = vpop.xlane.xlu0 %1525  ;;  %v5359_v59 = vmul.f32 %v5066_v12, %v1573_v28  ;;  %v2330_v39 = vmul.f32 %v4192_v6, %v4935_v55  ;;  %v1410_v20 = vpop.f32.mrb[32].mxu1 }
 0x2b6   : > { %v4194_v16 = vpop.eup %4193  ;;  %v1543_v56 = vmax.f32 %v1526_v53, 1e-24  ;;  %v1528_v32 = vpop.xlane.xlu1 %1527  ;;  %v2301_v53 = vmax.f32 %v2284_v7, 1e-24  ;;  %v5380_v50 = vmul.f32 %v5087_v18, %v2211_v3 }
 0x2b7   : > { %5874 = vst [vmem:[#allocation37_spill] sm:$0xff] %v5359_v59  ;;  %1837 = vrot.lane.b32.xlu1 %v5356_v15, %s4399_s22  ;;  %1759 = vrot.lane.b32.xlu0 %v5359_v59, %s4399_s22  ;;  %v1692_v60 = vmul.f32 %v4194_v16, %v4945_v17  ;;  %v4196_v52 = vpop.eup %4195  ;;  %v1372_v16 = vpop.f32.mrb[33].mxu0  ;;  %v1544_v27 = vmax.f32 %v1528_v32, 1e-24 }
 0x2b8   : > { %4203 = vrsqrt.f32 %v1543_v56  ;;  %v4198_v28 = vpop.eup %4197  ;;  %v1412_v37 = vpop.f32.mrb[33].mxu1  ;;  %v2331_v7 = vmul.f32 %v4196_v52, %v4951_v40 }
 0x2b9   : > { %v1645_v23 = vpop.xlane.xlu0 %1644  ;;  %v5372_v58 = vmul.f32 %v5075_v25, %v1692_v60  ;;  %4205 = vrsqrt.f32 %v2181_v44  ;;  %v1374_v55 = vpop.f32.mrb[34].mxu0 }
 0x2ba   : > { %v1662_v59 = vmax.f32 %v1645_v23, 1e-24  ;;  %v1647_v17 = vpop.xlane.xlu1 %1646  ;;  %4207 = vrsqrt.f32 %v2300_v14  ;;  %v4200_v6 = vpop.eup %4199  ;;  %v3570_v56 = vpack.c.bf16 %v1374_v55, %v1370_v0  ;;  %v5384_v23 = vmul.f32 %v5103_v11, %v2330_v39 }
 0x2bb   : > { %5876 = vst [vmem:[#allocation39_spill] sm:$0xff] %v5372_v58  ;;  %2397 = vrot.lane.b32.xlu1 %v5369_v49, %s4399_s22  ;;  %1839 = vrot.lane.b32.xlu0 %v5372_v58, %s4399_s22  ;;  %v1414_v44 = vpop.f32.mrb[34].mxu1  ;;  %v1376_v14 = vpop.f32.mrb[35].mxu0  ;;  %v1574_v58 = vmul.f32 %v4198_v28, %v4947_v61  ;;  %v1693_v61 = vmul.f32 %v4200_v6, %v4957_v8 }
 0x2bc   : > { %4209 = vrsqrt.f32 %v1662_v59  ;;  %v3590_v22 = vpack.c.bf16 %v1414_v44, %v1410_v20  ;;  %v3690_v3 = vpack.c.bf16 %v1376_v14, %v1372_v16  ;;  %v1416_v49 = vpop.f32.mrb[35].mxu1  ;;  %3571 = vst [vmem:[%s5388_s29] sm:$0xff] %v3570_v56   ;;  %v1663_v59 = vmax.f32 %v1647_v17, 1e-24  ;;  %v1380_v32 = vpop.f32.mrb[36].mxu0 }
 0x2bd   : > { %v2166_v60 = vpop.xlane.xlu0 %2165  ;;  %4211 = vrsqrt.f32 %v2301_v53  ;;  %v3710_v40 = vpack.c.bf16 %v1416_v49, %v1412_v37  ;;  %v4202_v0 = vpop.eup %4201  ;;  %v5400_v39 = vmul.f32 %v5066_v12, %v1574_v58  ;;  %v5403_v49 = vmul.f32 %v5103_v11, %v2331_v7 }
 0x2be   : > { %3744 = vst [vmem:[%s5388_s29 + $0x20] sm:$0xff] %v3590_v22   ;;  %3764 = vst [vmem:[%s5388_s29 + $0x40] sm:$0xff] %v3690_v3   ;;  %4213 = vrsqrt.f32 %v1544_v27  ;;  %v1420_v20 = vpop.f32.mrb[36].mxu1  ;;  %v1382_v53 = vpop.f32.mrb[37].mxu0  ;;  %v5410_v8 = vmul.f32 %v5075_v25, %v1693_v61  ;;  %v2182_v55 = vmax.f32 %v2166_v60, 1e-24 }
 0x2bf   : > { %2477 = vrot.lane.b32.xlu1 %v5384_v23, %s4399_s22  ;;  %2399 = vrot.lane.b32.xlu0 %v5380_v50, %s4399_s22  ;;  %3768 = vst [vmem:[%s5388_s29 + $0x60] sm:$0xff] %v3710_v40   ;;  %v1422_v16 = vpop.f32.mrb[37].mxu1  ;;  %v1384_v17 = vpop.f32.mrb[38].mxu0  ;;  %4215 = vrsqrt.f32 %v1663_v59 }
 0x2c0   : > { %v1424_v58 = vpop.f32.mrb[38].mxu1  ;;  %v3575_v27 = vpack.c.bf16 %v1384_v17, %v1380_v32  ;;  %v1386_v7 = vpop.f32.mrb[39].mxu0  ;;  %4217 = vrsqrt.f32 %v2182_v55  ;;  %v5441_v17 = vld [vmem:[%s4710_s13] sm:$0xff]  ;;  %v5448_v55 = vld [vmem:[%s4710_s13 + $0x8] sm:$0xff] }
 0x2c1   : > { %v2286_v52 = vpop.xlane.xlu0 %2285  ;;  %v3595_v6 = vpack.c.bf16 %v1424_v58, %v1420_v20  ;;  %v1426_v44 = vpop.f32.mrb[39].mxu1  ;;  %v3695_v40 = vpack.c.bf16 %v1386_v7, %v1382_v53  ;;  %v5431_v20 = vld [vmem:[%s5428_s12] sm:$0xff] }
 0x2c2   : > { %v4204_v28 = vpop.eup %4203  ;;  %v3715_v61 = vpack.c.bf16 %v1426_v44, %v1422_v16  ;;  %3741 = vst [vmem:[%s5388_s29 + $0x8] sm:$0xff] %v3575_v27   ;;  %v2302_v32 = vmax.f32 %v2286_v52, 1e-24 }
 0x2c3   : > { %1761 = vrot.lane.b32.xlu1 %v5400_v39, %s4399_s22  ;;  %2479 = vrot.lane.b32.xlu0 %v5403_v49, %s4399_s22  ;;  %v1575_v22 = vmul.f32 %v4204_v28, %v4969_v51  ;;  %v4206_v37 = vpop.eup %4205  ;;  %v2212_v51 = vmul.f32 %v4202_v0, %v4953_v35  ;;  %3745 = vst [vmem:[%s5388_s29 + $0x28] sm:$0xff] %v3595_v6   ;;  %3765 = vst [vmem:[%s5388_s29 + $0x48] sm:$0xff] %v3695_v40  }
 0x2c4   : > { %v4208_v56 = vpop.eup %4207  ;;  %v2213_v59 = vmul.f32 %v4206_v37, %v4971_v31  ;;  %3769 = vst [vmem:[%s5388_s29 + $0x68] sm:$0xff] %v3715_v61   ;;  %v1390_v0 = vpop.f32.mrb[40].mxu0  ;;  %v5451_v6 = vld [vmem:[%s5428_s12 + $0x8] sm:$0xff]  ;;  %4219 = vrsqrt.f32 %v2302_v32 }
 0x2c5   : > { %v1736_v14 = vpop.permute.xlu0 %1735  ;;  %v5414_v3 = vmul.f32 %v5066_v12, %v1575_v22  ;;  %v5434_v16 = vmul.f32 %v5087_v18, %v2212_v51  ;;  %v2332_v31 = vmul.f32 %v4208_v56, %v4960_v43  ;;  %v1430_v22 = vpop.f32.mrb[40].mxu1 }
 0x2c6   : > { %v4210_v28 = vpop.eup %4209  ;;  %v1392_v52 = vpop.f32.mrb[41].mxu0  ;;  %v5454_v27 = vmul.f32 %v5087_v18, %v2213_v59  ;;  %v1767_v56 = vmul.f32 %v1736_v14, %v5431_v20  ;;  %v1719_v14 = vmul.f32 %v5070_v13, %v5441_v17 }
 0x2c7   : > { %5877 = vst [vmem:[#allocation53_spill] sm:$0xff] %v5414_v3  ;;  %1841 = vrot.lane.b32.xlu1 %v5410_v8, %s4399_s22  ;;  %1763 = vrot.lane.b32.xlu0 %v5414_v3, %s4399_s22  ;;  %v1694_v60 = vmul.f32 %v4210_v28, %v4973_v1  ;;  %v4212_v35 = vpop.eup %4211  ;;  %v1432_v37 = vpop.f32.mrb[41].mxu1  ;;  %v5459_v59 = vmul.f32 %v5103_v11, %v2332_v31 }
 0x2c8   : > { %v4214_v58 = vpop.eup %4213  ;;  %5879 = vst [vmem:[#allocation55_spill] sm:$0xff] %v5454_v27  ;;  %v2333_v43 = vmul.f32 %v4212_v35, %v4977_v2  ;;  %v1434_v7 = vpop.f32.mrb[42].mxu1 }
 0x2c9   : > { %v1816_v53 = vpop.permute.xlu0 %1815  ;;  %v5437_v1 = vmul.f32 %v5075_v25, %v1694_v60  ;;  %v1394_v44 = vpop.f32.mrb[42].mxu0  ;;  %v3600_v51 = vpack.c.bf16 %v1434_v7, %v1430_v22  ;;  %5880 = vst [vmem:[#allocation56_spill] sm:$0xff] %v5459_v59  ;;  %v1576_v2 = vmul.f32 %v4214_v58, %v4975_v24  ;;  %v5881_v22 = vld [vmem:[#allocation44_spill] sm:$0xff]  ;;  %v1783_v24 = vadd.f32 %v1767_v56, %v1719_v14 }
 0x2ca   : > { %v3580_v40 = vpack.c.bf16 %v1394_v44, %v1390_v0  ;;  %v1396_v61 = vpop.f32.mrb[43].mxu0  ;;  %v1436_v28 = vpop.f32.mrb[43].mxu1  ;;  %v1720_v0 = vmul.f32 %v5881_v22, %v5448_v55  ;;  %v1847_v31 = vmul.f32 %v1816_v53, %v5431_v20  ;;  %v5886_v53 = vld [vmem:[#allocation46_spill] sm:$0xff] }
 0x2cb   : > { %5878 = vst [vmem:[#allocation54_spill] sm:$0xff] %v5437_v1  ;;  %2401 = vrot.lane.b32.xlu1 %v5434_v16, %s4399_s22  ;;  %1843 = vrot.lane.b32.xlu0 %v5437_v1, %s4399_s22  ;;  %v3700_v35 = vpack.c.bf16 %v1396_v61, %v1392_v52  ;;  %v3720_v3 = vpack.c.bf16 %v1436_v28, %v1432_v37  ;;  %v4216_v32 = vpop.eup %4215  ;;  %3746 = vst [vmem:[%s5388_s29 + $0x30] sm:$0xff] %v3600_v51  }
 0x2cc   : > { %3742 = vst [vmem:[%s5388_s29 + $0x10] sm:$0xff] %v3580_v40   ;;  %v1400_v13 = vpop.f32.mrb[44].mxu0  ;;  %v5477_v44 = vmul.f32 %v5066_v12, %v1576_v2  ;;  %v5480_v51 = vmul.f32 %v5103_v11, %v2333_v43  ;;  %v5884_v40 = vld [vmem:[#allocation41_spill] sm:$0xff]  ;;  %v4218_v28 = vpop.eup %4217 }
 0x2cd   : > { %v1738_v60 = vpop.permute.xlu1 %1737  ;;  %v2376_v1 = vpop.permute.xlu0 %2375  ;;  %3766 = vst [vmem:[%s5388_s29 + $0x50] sm:$0xff] %v3700_v35   ;;  %3770 = vst [vmem:[%s5388_s29 + $0x70] sm:$0xff] %v3720_v3   ;;  %v1695_v61 = vmul.f32 %v4216_v32, %v5884_v40  ;;  %v1800_v35 = vmul.f32 %v5886_v53, %v5448_v55  ;;  %v5887_v12 = vld [vmem:[#allocation45_spill] sm:$0xff] }
 0x2ce   : > { %v1768_v7 = vmul.f32 %v1738_v60, %v5451_v6  ;;  %5882 = vst [vmem:[#allocation44_spill] sm:$0xff] %v5477_v44  ;;  %5883 = vst [vmem:[#allocation57_spill] sm:$0xff] %v5480_v51  ;;  %v5885_v60 = vld [vmem:[#allocation43_spill] sm:$0xff]  ;;  %v1440_v22 = vpop.f32.mrb[44].mxu1  ;;  %v2359_v2 = vmul.f32 %v5887_v12, %v5441_v17 }
 0x2cf   : > { %2481 = vrot.lane.b32.xlu1 %v5459_v59, %s4399_s22  ;;  %2403 = vrot.lane.b32.xlu0 %v5454_v27, %s4399_s22  ;;  %v1799_v3 = vmul.f32 %v5885_v60, %v5441_v17  ;;  %v1442_v43 = vpop.f32.mrb[45].mxu1  ;;  %v5500_v12 = vmul.f32 %v5075_v25, %v1695_v61 }
 0x2d0   : > { %v1784_v58 = vadd.f32 %v1768_v7, %v1720_v0  ;;  %v1402_v0 = vpop.f32.mrb[45].mxu0 }
 0x2d1   : > { %v1818_v52 = vpop.permute.xlu1 %1817  ;;  %v2456_v37 = vpop.permute.xlu0 %2455  ;;  %v1863_v7 = vadd.f32 %v1847_v31, %v1799_v3 }
 0x2d2   : > { %v3490_v56 = vpack.c.bf16 %v1784_v58, %v1783_v24  ;;  %v1848_v14 = vmul.f32 %v1818_v52, %v5451_v6  ;;  %v1404_v32 = vpop.f32.mrb[46].mxu0  ;;  %v2407_v24 = vmul.f32 %v2376_v1, %v5431_v20  ;;  %v1444_v52 = vpop.f32.mrb[46].mxu1  ;;  %v5889_v1 = vld [vmem:[#allocation48_spill] sm:$0xff] }
 0x2d3   : > { %1765 = vrot.lane.b32.xlu1 %v5477_v44, %s4399_s22  ;;  %2483 = vrot.lane.b32.xlu0 %v5480_v51, %s4399_s22  ;;  %v3585_v40 = vpack.c.bf16 %v1404_v32, %v1400_v13  ;;  %v1406_v60 = vpop.f32.mrb[47].mxu0  ;;  %v5888_v51 = vld [vmem:[#allocation40_spill] sm:$0xff]  ;;  %v3605_v3 = vpack.c.bf16 %v1444_v52, %v1440_v22  ;;  %v4220_v44 = vpop.eup %4219  ;;  %v5891_v32 = vld [vmem:[#allocation47_spill] sm:$0xff]  ;;  %v1468_v52 = vld [vmem:[%s5428_s12 + $0x18] sm:$0xff] }
 0x2d4   : > { %3491 = vst [vmem:[%s5495_s4] sm:$0xff] %v3490_v56   ;;  %v1864_v58 = vadd.f32 %v1848_v14, %v1800_v35  ;;  %v2214_v31 = vmul.f32 %v4218_v28, %v5888_v51  ;;  %v3705_v27 = vpack.c.bf16 %v1406_v60, %v1402_v0  ;;  %v1446_v56 = vpop.f32.mrb[47].mxu1  ;;  %v2360_v35 = vmul.f32 %v5889_v1, %v5448_v55  ;;  %v5890_v0 = vld [vmem:[#allocation42_spill] sm:$0xff] }
 0x2d5   : > { %v2378_v53 = vpop.permute.xlu1 %2377  ;;  %3743 = vst [vmem:[%s5388_s29 + $0x18] sm:$0xff] %v3585_v40   ;;  %v3725_v14 = vpack.c.bf16 %v1446_v56, %v1442_v43  ;;  %3747 = vst [vmem:[%s5388_s29 + $0x38] sm:$0xff] %v3605_v3   ;;  %v2423_v25 = vadd.f32 %v2407_v24, %v2359_v2  ;;  %v2487_v51 = vmul.f32 %v2456_v37, %v5431_v20 }
 0x2d6   : > { %v3530_v59 = vpack.c.bf16 %v1864_v58, %v1863_v7  ;;  %v2408_v13 = vmul.f32 %v2378_v53, %v5451_v6  ;;  %3767 = vst [vmem:[%s5388_s29 + $0x58] sm:$0xff] %v3705_v27   ;;  %v5518_v22 = vmul.f32 %v5087_v18, %v2214_v31  ;;  %v2334_v43 = vmul.f32 %v4220_v44, %v5890_v0  ;;  %v1467_v58 = vld [vmem:[%s5428_s12 + $0x10] sm:$0xff] }
 0x2d7   : > { %1845 = vrot.lane.b32.xlu1 %v5500_v12, %s4399_s22  ;;  %3771 = vst [vmem:[%s5388_s29 + $0x78] sm:$0xff] %v3725_v14   ;;  %v2439_v27 = vmul.f32 %v5891_v32, %v5441_v17 }
 0x2d8   : > { %3531 = vst [vmem:[%s5512_s11] sm:$0xff] %v3530_v59   ;;  %v2424_v61 = vadd.f32 %v2408_v13, %v2360_v35  ;;  %v2440_v59 = vmul.f32 %v5128_v30, %v5448_v55  ;;  %v5530_v7 = vmul.f32 %v5103_v11, %v2334_v43  ;;  %v1451_v55 = vld [vmem:[%s4710_s13 + $0x10] sm:$0xff] }
 0x2d9   : > { %v2458_v28 = vpop.permute.xlu1 %2457  ;;  %v2503_v18 = vadd.f32 %v2487_v51, %v2439_v27  ;;  %v1820_v24 = vpop.permute.xlu0 %1819  ;;  %v1721_v31 = vmul.f32 %v5140_v5, %v1451_v55 }
 0x2da   : > { %v3610_v2 = vpack.c.bf16 %v2424_v61, %v2423_v25  ;;  %v2488_v20 = vmul.f32 %v2458_v28, %v5451_v6  ;;  %v1452_v6 = vld [vmem:[%s4710_s13 + $0x18] sm:$0xff]  ;;  %v1849_v56 = vmul.f32 %v1820_v24, %v1467_v58  ;;  %v1801_v25 = vmul.f32 %v5131_v46, %v1451_v55  ;;  %v5892_v61 = vld [vmem:[#allocation51_spill] sm:$0xff]  ;;  %v1469_v24 = vld [vmem:[%s5428_s12 + $0x20] sm:$0xff] }
 0x2db   : > { %2405 = vrot.lane.b32.xlu1 %v5518_v22, %s4399_s22  ;;  %v1722_v11 = vmul.f32 %v5157_v19, %v1452_v6  ;;  %v1802_v28 = vmul.f32 %v5892_v61, %v1452_v6 }
 0x2dc   : > { %3748 = vst [vmem:[%s5495_s4 + $0x40] sm:$0xff] %v3610_v2   ;;  %v2504_v37 = vadd.f32 %v2488_v20, %v2440_v59  ;;  %v1865_v43 = vadd.f32 %v1849_v56, %v1801_v25  ;;  %v5893_v2 = vld [vmem:[#allocation50_spill] sm:$0xff] }
 0x2dd   : > { %v1740_v44 = vpop.permute.xlu1 %1739  ;;  %v2460_v60 = vpop.permute.xlu0 %2459  ;;  %v2361_v59 = vmul.f32 %v5893_v2, %v1451_v55 }
 0x2de   : > { %v3650_v17 = vpack.c.bf16 %v2504_v37, %v2503_v18  ;;  %v1769_v40 = vmul.f32 %v1740_v44, %v1467_v58  ;;  %v2362_v18 = vmul.f32 %v5176_v48, %v1452_v6  ;;  %v2489_v37 = vmul.f32 %v2460_v60, %v1467_v58  ;;  %v1453_v60 = vld [vmem:[%s4710_s13 + $0x20] sm:$0xff] }
 0x2df   : > { %2485 = vrot.lane.b32.xlu1 %v5530_v7, %s4399_s22 }
 0x2e0   : > { %3756 = vst [vmem:[%s5512_s11 + $0x40] sm:$0xff] %v3650_v17   ;;  %v1785_v1 = vadd.f32 %v1769_v40, %v1721_v31 }
 0x2e1   : > { %v2380_v30 = vpop.permute.xlu1 %2379 }
 0x2e2   : > { %v2409_v32 = vmul.f32 %v2380_v30, %v1467_v58 }
 0x2e4   : > { %v2425_v44 = vadd.f32 %v2409_v32, %v2361_v59  ;;  %v5897_v32 = vld [vmem:[#allocation28_spill] sm:$0xff] }
 0x2e5   : > { %v1742_v53 = vpop.permute.xlu1 %1741 }
 0x2e6   : > { %v1770_v3 = vmul.f32 %v1742_v53, %v1468_v52  ;;  %v5894_v53 = vld [vmem:[#allocation49_spill] sm:$0xff] }
 0x2e7   : > { %v2441_v31 = vmul.f32 %v5894_v53, %v1451_v55 }
 0x2e8   : > { %v1786_v35 = vadd.f32 %v1770_v3, %v1722_v11  ;;  %v5895_v3 = vld [vmem:[#allocation29_spill] sm:$0xff] }
 0x2e9   : > { %v1822_v13 = vpop.permute.xlu1 %1821  ;;  %v1744_v14 = vpop.permute.xlu0 %1743  ;;  %v2442_v56 = vmul.f32 %v5895_v3, %v1452_v6  ;;  %v2505_v48 = vadd.f32 %v2489_v37, %v2441_v31  ;;  %v5900_v3 = vld [vmem:[#allocation27_spill] sm:$0xff] }
 0x2ea   : > { %v3495_v51 = vpack.c.bf16 %v1786_v35, %v1785_v1  ;;  %v1850_v0 = vmul.f32 %v1822_v13, %v1468_v52  ;;  %v1454_v35 = vld [vmem:[%s4710_s13 + $0x28] sm:$0xff]  ;;  %v1771_v25 = vmul.f32 %v1744_v14, %v1469_v24 }
 0x2eb   : > { %v1470_v13 = vld [vmem:[%s5428_s12 + $0x28] sm:$0xff]  ;;  %v1724_v55 = vmul.f32 %v5897_v32, %v1454_v35 }
 0x2ec   : > { %3727 = vst [vmem:[%s5495_s4 + $0x8] sm:$0xff] %v3495_v51   ;;  %v1866_v5 = vadd.f32 %v1850_v0, %v1802_v28  ;;  %v5896_v28 = vld [vmem:[#allocation52_spill] sm:$0xff] }
 0x2ed   : > { %v2382_v27 = vpop.permute.xlu1 %2381  ;;  %v1824_v19 = vpop.permute.xlu0 %1823  ;;  %v1723_v0 = vmul.f32 %v5896_v28, %v1453_v60  ;;  %v1471_v28 = vld [vmem:[%s5428_s12 + $0x30] sm:$0xff] }
 0x2ee   : > { %v3535_v20 = vpack.c.bf16 %v1866_v5, %v1865_v43  ;;  %v2410_v46 = vmul.f32 %v2382_v27, %v1468_v52  ;;  %v1851_v6 = vmul.f32 %v1824_v19, %v1469_v24  ;;  %v2363_v19 = vmul.f32 %v5900_v3, %v1453_v60 }
 0x2ef   : > { %v1787_v27 = vadd.f32 %v1771_v25, %v1723_v0 }
 0x2f0   : > { %3734 = vst [vmem:[%s5512_s11 + $0x8] sm:$0xff] %v3535_v20   ;;  %v2426_v17 = vadd.f32 %v2410_v46, %v2362_v18  ;;  %v5898_v20 = vld [vmem:[#allocation26_spill] sm:$0xff]  ;;  %v5899_v46 = vld [vmem:[#allocation31_spill] sm:$0xff] }
 0x2f1   : > { %v2462_v30 = vpop.permute.xlu1 %2461  ;;  %v2384_v40 = vpop.permute.xlu0 %2383  ;;  %v1803_v14 = vmul.f32 %v5898_v20, %v1453_v60  ;;  %v1804_v37 = vmul.f32 %v5899_v46, %v1454_v35 }
 0x2f2   : > { %v3615_v11 = vpack.c.bf16 %v2426_v17, %v2425_v44  ;;  %v2490_v1 = vmul.f32 %v2462_v30, %v1468_v52  ;;  %v2411_v30 = vmul.f32 %v2384_v40, %v1469_v24 }
 0x2f3   : > { %v1867_v17 = vadd.f32 %v1851_v6, %v1803_v14  ;;  %v1456_v6 = vld [vmem:[%s4710_s13 + $0x38] sm:$0xff] }
 0x2f4   : > { %3749 = vst [vmem:[%s5495_s4 + $0x48] sm:$0xff] %v3615_v11   ;;  %v2506_v58 = vadd.f32 %v2490_v1, %v2442_v56  ;;  %v2364_v1 = vmul.f32 %v5224_v10, %v1454_v35  ;;  %v2427_v25 = vadd.f32 %v2411_v30, %v2363_v19  ;;  %v1806_v3 = vmul.f32 %v5260_v29, %v1456_v6 }
 0x2f5   : > { %v1746_v51 = vpop.permute.xlu1 %1745  ;;  %v2464_v61 = vpop.permute.xlu0 %2463 }
 0x2f6   : > { %v3655_v43 = vpack.c.bf16 %v2506_v58, %v2505_v48  ;;  %v1772_v5 = vmul.f32 %v1746_v51, %v1470_v13  ;;  %v2491_v58 = vmul.f32 %v2464_v61, %v1469_v24  ;;  %v1455_v24 = vld [vmem:[%s4710_s13 + $0x30] sm:$0xff] }
 0x2f8   : > { %3757 = vst [vmem:[%s5512_s11 + $0x48] sm:$0xff] %v3655_v43   ;;  %v1788_v52 = vadd.f32 %v1772_v5, %v1724_v55  ;;  %v5901_v43 = vld [vmem:[#allocation30_spill] sm:$0xff]  ;;  %v2444_v5 = vmul.f32 %v5236_v33, %v1454_v35 }
 0x2f9   : > { %v1826_v2 = vpop.permute.xlu1 %1825  ;;  %v1748_v59 = vpop.permute.xlu0 %1747  ;;  %v2443_v32 = vmul.f32 %v5901_v43, %v1453_v60  ;;  %v1726_v60 = vmul.f32 %v5248_v9, %v1456_v6 }
 0x2fa   : > { %v3500_v18 = vpack.c.bf16 %v1788_v52, %v1787_v27  ;;  %v1852_v44 = vmul.f32 %v1826_v2, %v1470_v13  ;;  %v1472_v52 = vld [vmem:[%s5428_s12 + $0x38] sm:$0xff]  ;;  %v1773_v2 = vmul.f32 %v1748_v59, %v1471_v28 }
 0x2fb   : > { %v2507_v10 = vadd.f32 %v2491_v58, %v2443_v32  ;;  %v5904_v58 = vld [vmem:[#allocation32_spill] sm:$0xff] }
 0x2fc   : > { %3728 = vst [vmem:[%s5495_s4 + $0x10] sm:$0xff] %v3500_v18   ;;  %v1868_v53 = vadd.f32 %v1852_v44, %v1804_v37  ;;  %v5902_v18 = vld [vmem:[#allocation33_spill] sm:$0xff] }
 0x2fd   : > { %v2386_v31 = vpop.permute.xlu1 %2385  ;;  %v1828_v11 = vpop.permute.xlu0 %1827  ;;  %v1725_v46 = vmul.f32 %v5902_v18, %v1455_v24 }
 0x2fe   : > { %v3540_v56 = vpack.c.bf16 %v1868_v53, %v1867_v17  ;;  %v2412_v48 = vmul.f32 %v2386_v31, %v1470_v13  ;;  %v1853_v33 = vmul.f32 %v1828_v11, %v1471_v28  ;;  %v5903_v53 = vld [vmem:[#allocation35_spill] sm:$0xff]  ;;  %v2365_v11 = vmul.f32 %v5904_v58, %v1455_v24 }
 0x2ff   : > { %v1789_v17 = vadd.f32 %v1773_v2, %v1725_v46  ;;  %v1805_v59 = vmul.f32 %v5903_v53, %v1455_v24  ;;  %v1458_v46 = vld [vmem:[%s4710_s13 + $0x48] sm:$0xff] }
 0x300   : > { %3735 = vst [vmem:[%s5512_s11 + $0x10] sm:$0xff] %v3540_v56   ;;  %v2428_v51 = vadd.f32 %v2412_v48, %v2364_v1  ;;  %v2368_v58 = vmul.f32 %v5320_v54, %v1458_v46 }
 0x301   : > { %v2466_v40 = vpop.permute.xlu1 %2465  ;;  %v2388_v0 = vpop.permute.xlu0 %2387  ;;  %v1869_v56 = vadd.f32 %v1853_v33, %v1805_v59 }
 0x302   : > { %v3620_v55 = vpack.c.bf16 %v2428_v51, %v2427_v25  ;;  %v2492_v27 = vmul.f32 %v2466_v40, %v1470_v13  ;;  %v2413_v1 = vmul.f32 %v2388_v0, %v1471_v28  ;;  %v2366_v40 = vmul.f32 %v5272_v57, %v1456_v6 }
 0x304   : > { %3750 = vst [vmem:[%s5495_s4 + $0x50] sm:$0xff] %v3620_v55   ;;  %v2508_v20 = vadd.f32 %v2492_v27, %v2444_v5  ;;  %v2429_v32 = vadd.f32 %v2413_v1, %v2365_v11  ;;  %v1473_v5 = vld [vmem:[%s5428_s12 + $0x40] sm:$0xff] }
 0x305   : > { %v1750_v61 = vpop.permute.xlu1 %1749  ;;  %v2468_v14 = vpop.permute.xlu0 %2467 }
 0x306   : > { %v3660_v37 = vpack.c.bf16 %v2508_v20, %v2507_v10  ;;  %v1774_v44 = vmul.f32 %v1750_v61, %v1472_v52  ;;  %v2493_v55 = vmul.f32 %v2468_v14, %v1471_v28  ;;  %v5905_v10 = vld [vmem:[#allocation34_spill] sm:$0xff]  ;;  %v2446_v61 = vmul.f32 %v5284_v47, %v1456_v6 }
 0x307   : > { %v2445_v2 = vmul.f32 %v5905_v10, %v1455_v24  ;;  %v1457_v28 = vld [vmem:[%s4710_s13 + $0x40] sm:$0xff]  ;;  %v1728_v24 = vmul.f32 %v5296_v26, %v1458_v46  ;;  %v1476_v10 = vld [vmem:[%s5428_s12 + $0x58] sm:$0xff] }
 0x308   : > { %3758 = vst [vmem:[%s5512_s11 + $0x50] sm:$0xff] %v3660_v37   ;;  %v1790_v35 = vadd.f32 %v1774_v44, %v1726_v60  ;;  %v1474_v37 = vld [vmem:[%s5428_s12 + $0x48] sm:$0xff]  ;;  %v1727_v33 = vmul.f32 %v5263_v4, %v1457_v28 }
 0x309   : > { %v1830_v13 = vpop.permute.xlu1 %1829  ;;  %v1752_v30 = vpop.permute.xlu0 %1751  ;;  %v2509_v57 = vadd.f32 %v2493_v55, %v2445_v2  ;;  %v2447_v55 = vmul.f32 %v5299_v63, %v1457_v28 }
 0x30a   : > { %v3505_v31 = vpack.c.bf16 %v1790_v35, %v1789_v17  ;;  %v1854_v19 = vmul.f32 %v1830_v13, %v1472_v52  ;;  %v1775_v60 = vmul.f32 %v1752_v30, %v1473_v5  ;;  %v1807_v30 = vmul.f32 %v5275_v36, %v1457_v28 }
 0x30c   : > { %3729 = vst [vmem:[%s5495_s4 + $0x18] sm:$0xff] %v3505_v31   ;;  %v1870_v48 = vadd.f32 %v1854_v19, %v1806_v3  ;;  %v1791_v53 = vadd.f32 %v1775_v60, %v1727_v33  ;;  %v1808_v3 = vmul.f32 %v5308_v42, %v1458_v46 }
 0x30d   : > { %v2390_v9 = vpop.permute.xlu1 %2389  ;;  %v1832_v25 = vpop.permute.xlu0 %1831 }
 0x30e   : > { %v3545_v51 = vpack.c.bf16 %v1870_v48, %v1869_v56  ;;  %v2414_v43 = vmul.f32 %v2390_v9, %v1472_v52  ;;  %v1855_v47 = vmul.f32 %v1832_v25, %v1473_v5  ;;  %v2367_v9 = vmul.f32 %v5287_v45, %v1457_v28 }
 0x310   : > { %3736 = vst [vmem:[%s5512_s11 + $0x18] sm:$0xff] %v3545_v51   ;;  %v2430_v29 = vadd.f32 %v2414_v43, %v2366_v40  ;;  %v1871_v4 = vadd.f32 %v1855_v47, %v1807_v30  ;;  %v1475_v40 = vld [vmem:[%s5428_s12 + $0x50] sm:$0xff] }
 0x311   : > { %v2470_v0 = vpop.permute.xlu1 %2469  ;;  %v2392_v27 = vpop.permute.xlu0 %2391 }
 0x312   : > { %v3625_v20 = vpack.c.bf16 %v2430_v29, %v2429_v32  ;;  %v2494_v18 = vmul.f32 %v2470_v0, %v1472_v52  ;;  %v2415_v56 = vmul.f32 %v2392_v27, %v1473_v5  ;;  %v2448_v0 = vmul.f32 %v5332_v62, %v1458_v46  ;;  %v1460_v27 = vld [vmem:[%s4710_s13 + $0x58] sm:$0xff] }
 0x313   : > { %v1730_v63 = vmul.f32 %v5344_v41, %v1460_v27 }
 0x314   : > { %3751 = vst [vmem:[%s5495_s4 + $0x58] sm:$0xff] %v3625_v20   ;;  %v2510_v44 = vadd.f32 %v2494_v18, %v2446_v61  ;;  %v2431_v11 = vadd.f32 %v2415_v56, %v2367_v9  ;;  %v2450_v9 = vmul.f32 %v5384_v23, %v1460_v27 }
 0x315   : > { %v1754_v14 = vpop.permute.xlu1 %1753  ;;  %v2472_v17 = vpop.permute.xlu0 %2471 }
 0x316   : > { %v3665_v35 = vpack.c.bf16 %v2510_v44, %v2509_v57  ;;  %v1776_v13 = vmul.f32 %v1754_v14, %v1474_v37  ;;  %v2495_v51 = vmul.f32 %v2472_v17, %v1473_v5  ;;  %v1459_v5 = vld [vmem:[%s4710_s13 + $0x50] sm:$0xff] }
 0x317   : > { %v1729_v57 = vmul.f32 %v5311_v34, %v1459_v5  ;;  %v1809_v17 = vmul.f32 %v5323_v21, %v1459_v5 }
 0x318   : > { %3759 = vst [vmem:[%s5512_s11 + $0x58] sm:$0xff] %v3665_v35   ;;  %v1792_v6 = vadd.f32 %v1776_v13, %v1728_v24  ;;  %v2511_v54 = vadd.f32 %v2495_v51, %v2447_v55  ;;  %v1810_v35 = vmul.f32 %v5356_v15, %v1460_v27 }
 0x319   : > { %v1834_v52 = vpop.permute.xlu1 %1833  ;;  %v1756_v59 = vpop.permute.xlu0 %1755 }
 0x31a   : > { %v3510_v31 = vpack.c.bf16 %v1792_v6, %v1791_v53  ;;  %v1856_v19 = vmul.f32 %v1834_v52, %v1474_v37  ;;  %v1777_v2 = vmul.f32 %v1756_v59, %v1475_v40  ;;  %v2369_v6 = vmul.f32 %v5335_v38, %v1459_v5  ;;  %v5906_v59 = vld [vmem:[#allocation38_spill] sm:$0xff] }
 0x31b   : > { %v2370_v30 = vmul.f32 %v5906_v59, %v1460_v27 }
 0x31c   : > { %3730 = vst [vmem:[%s5495_s4 + $0x20] sm:$0xff] %v3510_v31   ;;  %v1872_v1 = vadd.f32 %v1856_v19, %v1808_v3  ;;  %v1793_v28 = vadd.f32 %v1777_v2, %v1729_v57  ;;  %v1477_v19 = vld [vmem:[%s5428_s12 + $0x60] sm:$0xff]  ;;  %v5909_v2 = vld [vmem:[#allocation39_spill] sm:$0xff] }
 0x31d   : > { %v2394_v26 = vpop.permute.xlu1 %2393  ;;  %v1836_v48 = vpop.permute.xlu0 %1835 }
 0x31e   : > { %v3550_v25 = vpack.c.bf16 %v1872_v1, %v1871_v4  ;;  %v2416_v36 = vmul.f32 %v2394_v26, %v1474_v37  ;;  %v1857_v62 = vmul.f32 %v1836_v48, %v1475_v40  ;;  %v5907_v1 = vld [vmem:[#allocation36_spill] sm:$0xff] }
 0x31f   : > { %v2449_v26 = vmul.f32 %v5907_v1, %v1459_v5 }
 0x320   : > { %3737 = vst [vmem:[%s5512_s11 + $0x20] sm:$0xff] %v3550_v25   ;;  %v2432_v42 = vadd.f32 %v2416_v36, %v2368_v58  ;;  %v1873_v34 = vadd.f32 %v1857_v62, %v1809_v17  ;;  %v1462_v25 = vld [vmem:[%s4710_s13 + $0x68] sm:$0xff] }
 0x321   : > { %v2474_v43 = vpop.permute.xlu1 %2473  ;;  %v2396_v32 = vpop.permute.xlu0 %2395  ;;  %v1478_v58 = vld [vmem:[%s5428_s12 + $0x68] sm:$0xff] }
 0x322   : > { %v3630_v29 = vpack.c.bf16 %v2432_v42, %v2431_v11  ;;  %v2496_v45 = vmul.f32 %v2474_v43, %v1474_v37  ;;  %v2417_v13 = vmul.f32 %v2396_v32, %v1475_v40  ;;  %v1461_v42 = vld [vmem:[%s4710_s13 + $0x60] sm:$0xff]  ;;  %v5908_v32 = vld [vmem:[#allocation37_spill] sm:$0xff] }
 0x323   : > { %v1731_v55 = vmul.f32 %v5908_v32, %v1461_v42 }
 0x324   : > { %3752 = vst [vmem:[%s5495_s4 + $0x60] sm:$0xff] %v3630_v29   ;;  %v2512_v20 = vadd.f32 %v2496_v45, %v2448_v0  ;;  %v2433_v31 = vadd.f32 %v2417_v13, %v2369_v6  ;;  %v1732_v0 = vmul.f32 %v5400_v39, %v1462_v25  ;;  %v1480_v6 = vld [vmem:[%s5428_s12 + $0x78] sm:$0xff] }
 0x325   : > { %v1758_v61 = vpop.permute.xlu1 %1757  ;;  %v2476_v18 = vpop.permute.xlu0 %2475 }
 0x326   : > { %v3670_v60 = vpack.c.bf16 %v2512_v20, %v2511_v54  ;;  %v1778_v44 = vmul.f32 %v1758_v61, %v1476_v10  ;;  %v2497_v3 = vmul.f32 %v2476_v18, %v1475_v40  ;;  %v1811_v20 = vmul.f32 %v5909_v2, %v1461_v42  ;;  %v5915_v2 = vld [vmem:[#allocation57_spill] sm:$0xff] }
 0x327   : > { %v1812_v61 = vmul.f32 %v5410_v8, %v1462_v25 }
 0x328   : > { %3760 = vst [vmem:[%s5512_s11 + $0x60] sm:$0xff] %v3670_v60   ;;  %v1794_v46 = vadd.f32 %v1778_v44, %v1730_v63  ;;  %v2513_v36 = vadd.f32 %v2497_v3, %v2449_v26 }
 0x329   : > { %v1838_v37 = vpop.permute.xlu1 %1837  ;;  %v1760_v14 = vpop.permute.xlu0 %1759 }
 0x32a   : > { %v3515_v33 = vpack.c.bf16 %v1794_v46, %v1793_v28  ;;  %v1858_v24 = vmul.f32 %v1838_v37, %v1476_v10  ;;  %v1779_v11 = vmul.f32 %v1760_v14, %v1477_v19  ;;  %v2371_v28 = vmul.f32 %v5380_v50, %v1461_v42 }
 0x32b   : > { %v2372_v46 = vmul.f32 %v5434_v16, %v1462_v25 }
 0x32c   : > { %3731 = vst [vmem:[%s5495_s4 + $0x28] sm:$0xff] %v3515_v33   ;;  %v1874_v53 = vadd.f32 %v1858_v24, %v1810_v35  ;;  %v1795_v54 = vadd.f32 %v1779_v11, %v1731_v55  ;;  %v1479_v33 = vld [vmem:[%s5428_s12 + $0x70] sm:$0xff]  ;;  %v5914_v55 = vld [vmem:[#allocation55_spill] sm:$0xff] }
 0x32d   : > { %v2398_v41 = vpop.permute.xlu1 %2397  ;;  %v1840_v47 = vpop.permute.xlu0 %1839 }
 0x32e   : > { %v3555_v52 = vpack.c.bf16 %v1874_v53, %v1873_v34  ;;  %v2418_v21 = vmul.f32 %v2398_v41, %v1476_v10  ;;  %v1859_v23 = vmul.f32 %v1840_v47, %v1477_v19  ;;  %v2451_v34 = vmul.f32 %v5403_v49, %v1461_v42  ;;  %v5910_v53 = vld [vmem:[#allocation56_spill] sm:$0xff]  ;;  %v1464_v47 = vld [vmem:[%s4710_s13 + $0x78] sm:$0xff] }
 0x32f   : > { %v2452_v41 = vmul.f32 %v5910_v53, %v1462_v25 }
 0x330   : > { %3738 = vst [vmem:[%s5512_s11 + $0x28] sm:$0xff] %v3555_v52   ;;  %v2434_v15 = vadd.f32 %v2418_v21, %v2370_v30  ;;  %v1875_v60 = vadd.f32 %v1859_v23, %v1811_v20  ;;  %v1463_v30 = vld [vmem:[%s4710_s13 + $0x70] sm:$0xff]  ;;  %s5651_s13 = scalar_lea.sflag [#allocation11], %s353_s26 }
 0x331   : > { %v2478_v4 = vpop.permute.xlu1 %2477  ;;  %v2400_v56 = vpop.permute.xlu0 %2399  ;;  %v2453_v20 = vmul.f32 %v5915_v2, %v1463_v30 }
 0x332   : > { %v3635_v48 = vpack.c.bf16 %v2434_v15, %v2433_v31  ;;  %v2498_v38 = vmul.f32 %v2478_v4, %v1476_v10  ;;  %v2419_v63 = vmul.f32 %v2400_v56, %v1477_v19  ;;  %v5911_v31 = vld [vmem:[#allocation53_spill] sm:$0xff] }
 0x333   : > { %v1733_v3 = vmul.f32 %v5911_v31, %v1463_v30 }
 0x334   : > { %3753 = vst [vmem:[%s5495_s4 + $0x68] sm:$0xff] %v3635_v48   ;;  %v2514_v51 = vadd.f32 %v2498_v38, %v2450_v9  ;;  %v2435_v14 = vadd.f32 %v2419_v63, %v2371_v28  ;;  %v5913_v38 = vld [vmem:[#allocation54_spill] sm:$0xff] }
 0x335   : > { %v1762_v40 = vpop.permute.xlu1 %1761  ;;  %v2480_v43 = vpop.permute.xlu0 %2479  ;;  %v1813_v25 = vmul.f32 %v5913_v38, %v1463_v30 }
 0x336   : > { %v3675_v29 = vpack.c.bf16 %v2514_v51, %v2513_v36  ;;  %v1780_v45 = vmul.f32 %v1762_v40, %v1478_v58  ;;  %v2499_v17 = vmul.f32 %v2480_v43, %v1477_v19  ;;  %v5912_v19 = vld [vmem:[#allocation44_spill] sm:$0xff]  ;;  %v1814_v36 = vmul.f32 %v5500_v12, %v1464_v47 }
 0x337   : > { %v1734_v4 = vmul.f32 %v5912_v19, %v1464_v47 }
 0x338   : > { %3761 = vst [vmem:[%s5512_s11 + $0x68] sm:$0xff] %v3675_v29   ;;  %v1796_v27 = vadd.f32 %v1780_v45, %v1732_v0  ;;  %v2515_v16 = vadd.f32 %v2499_v17, %v2451_v34  ;;  %v2373_v29 = vmul.f32 %v5914_v55, %v1463_v30  ;;  %v2374_v45 = vmul.f32 %v5518_v22, %v1464_v47 }
 0x339   : > { %v1842_v10 = vpop.permute.xlu1 %1841  ;;  %v1764_v57 = vpop.permute.xlu0 %1763 }
 0x33a   : > { %v3520_v5 = vpack.c.bf16 %v1796_v27, %v1795_v54  ;;  %v1860_v18 = vmul.f32 %v1842_v10, %v1478_v58  ;;  %v1781_v52 = vmul.f32 %v1764_v57, %v1479_v33 }
 0x33c   : > { %3732 = vst [vmem:[%s5495_s4 + $0x30] sm:$0xff] %v3520_v5   ;;  %v1876_v44 = vadd.f32 %v1860_v18, %v1812_v61  ;;  %v1797_v1 = vadd.f32 %v1781_v52, %v1733_v3  ;;  %v2454_v61 = vmul.f32 %v5530_v7, %v1464_v47 }
 0x33d   : > { %v2402_v39 = vpop.permute.xlu1 %2401  ;;  %v1844_v35 = vpop.permute.xlu0 %1843 }
 0x33e   : > { %v3560_v62 = vpack.c.bf16 %v1876_v44, %v1875_v60  ;;  %v2420_v37 = vmul.f32 %v2402_v39, %v1478_v58  ;;  %v1861_v26 = vmul.f32 %v1844_v35, %v1479_v33 }
 0x340   : > { %3739 = vst [vmem:[%s5512_s11 + $0x30] sm:$0xff] %v3560_v62   ;;  %v2436_v8 = vadd.f32 %v2420_v37, %v2372_v46  ;;  %v1877_v51 = vadd.f32 %v1861_v26, %v1813_v25 }
 0x341   : > { %v2482_v24 = vpop.permute.xlu1 %2481  ;;  %v2404_v56 = vpop.permute.xlu0 %2403 }
 0x342   : > { %v3640_v13 = vpack.c.bf16 %v2436_v8, %v2435_v14  ;;  %v2500_v50 = vmul.f32 %v2482_v24, %v1478_v58  ;;  %v2421_v42 = vmul.f32 %v2404_v56, %v1479_v33 }
 0x344   : > { %3754 = vst [vmem:[%s5495_s4 + $0x70] sm:$0xff] %v3640_v13   ;;  %v2516_v59 = vadd.f32 %v2500_v50, %v2452_v41  ;;  %v2437_v23 = vadd.f32 %v2421_v42, %v2373_v29 }
 0x345   : > { %v1766_v21 = vpop.permute.xlu1 %1765  ;;  %v2484_v43 = vpop.permute.xlu0 %2483 }
 0x346   : > { %v3680_v15 = vpack.c.bf16 %v2516_v59, %v2515_v16  ;;  %v1782_v49 = vmul.f32 %v1766_v21, %v1480_v6  ;;  %v2501_v27 = vmul.f32 %v2484_v43, %v1479_v33 }
 0x348   : > { %3762 = vst [vmem:[%s5512_s11 + $0x70] sm:$0xff] %v3680_v15   ;;  %v1798_v48 = vadd.f32 %v1782_v49, %v1734_v4  ;;  %v2517_v57 = vadd.f32 %v2501_v27, %v2453_v20 }
 0x349   : > { %v1846_v9 = vpop.permute.xlu1 %1845 }
 0x34a   : > { %v3525_v58 = vpack.c.bf16 %v1798_v48, %v1797_v1  ;;  %v1862_v11 = vmul.f32 %v1846_v9, %v1480_v6 }
 0x34c   : > { %3733 = vst [vmem:[%s5495_s4 + $0x38] sm:$0xff] %v3525_v58   ;;  %v1878_v40 = vadd.f32 %v1862_v11, %v1814_v36 }
 0x34d   : > { %v2406_v32 = vpop.permute.xlu1 %2405 }
 0x34e   : > { %v3565_v0 = vpack.c.bf16 %v1878_v40, %v1877_v51  ;;  %v2422_v54 = vmul.f32 %v2406_v32, %v1480_v6 }
 0x350   : > { %3740 = vst [vmem:[%s5512_s11 + $0x38] sm:$0xff] %v3565_v0   ;;  %v2438_v12 = vadd.f32 %v2422_v54, %v2374_v45 }
 0x351   : > { %v2486_v10 = vpop.permute.xlu1 %2485 }
 0x352   : > { %v3645_v5 = vpack.c.bf16 %v2438_v12, %v2437_v23  ;;  %v2502_v18 = vmul.f32 %v2486_v10, %v1480_v6 }
 0x354   : > { %3755 = vst [vmem:[%s5495_s4 + $0x78] sm:$0xff] %v3645_v5   ;;  %v2518_v60 = vadd.f32 %v2502_v18, %v2454_v61 }
 0x356   : > { %v3685_v63 = vpack.c.bf16 %v2518_v60, %v2517_v57 }
 0x358   : > { %3763 = vst [vmem:[%s5512_s11 + $0x78] sm:$0xff] %v3685_v63  }
 0x359   : > { %s5654_s14 = sshll.u32 %s4591_s20, 10  ;;  %s2802_s19 = sshll.u32 %s5495_s4, 4  ;;  %s2803_s19 = int_to_ptr.vmem [resolvable:$true] %s2802_s19 }
 0x35a   : > { %s2785_s25 = scalar_lea.hbm %s5741_s6, %s5654_s14  ;;  %s4400_s26 = smov 1024  }
 0x35b   : > { %p5916_p0 = scmp.ne.s32.totalorder %s5811_s17, 0  ;;  %s4401_s22 = smov 2048  }
 0x35c   : > { %s4402_s15 = smov 16   ;;  %s4403_s0 = smov 64  }
 0x35d   : > { %3814 = sst [smem:[#allocation14]] (%p5916_p0), %s4400_s26  ;;  %s4404_s20 = smov 4  }
 0x35e   : > { %3815 = sst [smem:[#allocation14 + $0x1]] (%p5916_p0), %s4401_s22  ;;  %s4405_s23 = smov [#allocation13]  }
 0x35f   : > { %3816 = sst [smem:[#allocation14 + $0x2]] (%p5916_p0), %s4402_s15  ;;  %s4406_s24 = smov 0  }
 0x360   : > { %3817 = sst [smem:[#allocation14 + $0x3]] (%p5916_p0), %s4403_s0 }
 0x361   : > { %3818 = sst [smem:[#allocation14 + $0x4]] (%p5916_p0), %s4403_s0 }
 0x362   : > { %3819 = sst [smem:[#allocation14 + $0x5]] (%p5916_p0), %s4404_s20 }
 0x363   : > { %3820 = dma.general (%p5916_p0), %s2803_s19, 2048, %s2785_s25, %s2763_s21, %s4405_s23, [#allocation14], %s4406_s24, 0  }
 0x364   : > { %s2830_s10 = scalar_lea.hbm %s5742_s7, %s5654_s14  ;;  %s2847_s16 = sshll.u32 %s5512_s11, 4  ;;  %s2848_s16 = int_to_ptr.vmem [resolvable:$true] %s2847_s16 }
 0x365   : > { %s4407_s26 = smov 1024   ;;  %s4408_s21 = smov 2048  }
 0x366   : > { %3821 = sst [smem:[#allocation16]] (%p5916_p0), %s4407_s26  ;;  %s4409_s19 = smov 16  }
 0x367   : > { %3822 = sst [smem:[#allocation16 + $0x1]] (%p5916_p0), %s4408_s21  ;;  %s4410_s25 = smov 64  }
 0x368   : > { %3823 = sst [smem:[#allocation16 + $0x2]] (%p5916_p0), %s4409_s19  ;;  %s4411_s22 = smov 4  }
 0x369   : > { %3824 = sst [smem:[#allocation16 + $0x3]] (%p5916_p0), %s4410_s25  ;;  %s4412_s15 = smov [#allocation15]  }
 0x36a   : > { %3825 = sst [smem:[#allocation16 + $0x4]] (%p5916_p0), %s4410_s25  ;;  %s4413_s11 = smov 0  }
 0x36b   : > { %3826 = sst [smem:[#allocation16 + $0x5]] (%p5916_p0), %s4411_s22 }
 0x36c   : > { %3827 = dma.general (%p5916_p0), %s2848_s16, 2048, %s2830_s10, %s5651_s13, %s4412_s15, [#allocation16], %s4413_s11, 0  }
 0x36d   : > { %s2875_s23 = scalar_lea.hbm %s5743_s8, %s5654_s14  ;;  %s2892_s24 = sshll.u32 %s5388_s29, 4  ;;  %s2893_s24 = int_to_ptr.vmem [resolvable:$true] %s2892_s24 }
 0x36e   : > { %s4414_s12 = smov 1024   ;;  %s4415_s4 = smov 2048  }
 0x36f   : > { %3828 = sst [smem:[#allocation18]] (%p5916_p0), %s4414_s12  ;;  %s4416_s10 = smov 16  }
 0x370   : > { %3829 = sst [smem:[#allocation18 + $0x1]] (%p5916_p0), %s4415_s4  ;;  %s4417_s16 = smov 64  }
 0x371   : > { %3830 = sst [smem:[#allocation18 + $0x2]] (%p5916_p0), %s4416_s10  ;;  %s4418_s26 = smov 4  }
 0x372   : > { %3831 = sst [smem:[#allocation18 + $0x3]] (%p5916_p0), %s4417_s16  ;;  %s4419_s14 = smov [#allocation17]  }
 0x373   : > { %3832 = sst [smem:[#allocation18 + $0x4]] (%p5916_p0), %s4417_s16  ;;  %s4420_s29 = smov 0  }
 0x374   : > { %3833 = sst [smem:[#allocation18 + $0x5]] (%p5916_p0), %s4418_s26 }
 0x375   : > { %3834 = dma.general (%p5916_p0), %s2893_s24, 2048, %s2875_s23, %s5651_s13, %s4419_s14, [#allocation18], %s4420_s29, 0  }
 0x376 PF: > { %s2920_s21 = sand.u32 1, %s4377_s27   ;;  %p5917_p13 = scmp.ne.s32.totalorder %s5812_s18, 0 }
 0x377   : > { %p5918_p10 = scmp.ge.s32.totalorder %s4389_s30, 2  ;;  %s2921_s19 = scalar_lea.sflag [#allocation4], %s2920_s21 }
 0x379   : > { %p3853_p6 = pnand %p5918_p10, %p5917_p13 }
 0x37b   : > { %4368 = dma.done.wait (!%p3853_p6), %s2921_s19, 2048  }
 0x37c   : > { %4370 = vsyncadd (!%p3853_p6), %s2921_s19, 4294965248  ;;  %s5919_s25 = sadd.s32 4294967294, %s4389_s30  }
 0x37d   : > { %s2929_s22 = sand.u32 1, %s5919_s25  }
 0x37e   : > { %s2930_s15 = scalar_lea.sflag [#allocation11], %s2929_s22 }
 0x37f   : > { %4372 = dma.done.wait (!%p3853_p6), %s2930_s15, 4096  }
 0x380   : > { %4374 = vsyncadd (!%p3853_p6), %s2930_s15, 4294963200  ;;  %s5920_s17 = sld [smem:[#allocation24_spill]]  ;;  %s5921_s29 = sld [smem:[#allocation25_spill]] }
 0x381   : > { %p26_p9 = scmp.ge.s32.totalorder %s4487_s9, 4   ;;  %s5922_s27 = smov %s4381_s28 }
 0x382   : > { %s5924_s30 = smov %s4487_s9 }
 0x383   :  { %28 = sbr.rel (!%p26_p9) target bundleno = 11 (0xb), region = 167 }
 0x386   : > { %s5923_s28 = smov %s5920_s17 }
 0x38a   :  { %2944 = vsyncpa [#allocation3], 1 }
 0x38b   :  { %2946 = vsyncpa [#allocation3 + $0x1], 1 }
 0x38c   :  { %2947 = vsyncpa [#allocation6], 1 }
 0x38d   :  { %2948 = vsyncpa [#allocation4], 1 }
 0x38e   :  { %2950 = vsyncpa [#allocation4 + $0x1], 1 }
 0x38f   :  { %2951 = vsyncpa [#allocation11], 1 }
 0x390   :  { %2953 = vsyncpa [#allocation11 + $0x1], 1 }

</bundles_post_ra>
